<compile_context>
chip_gen: v7x
topology: tpu7x:2x2x1
jax: 0.10.0
libtpu: 0.0.40
codegen_flags: <defaults>
</compile_context>

<pallas_src>
import functools

import jax
import jax.numpy as jnp
from jax.experimental import pallas as pl
from jax.experimental.pallas import tpu as pltpu


# ----------------------------------------------------------------------------
# Helpers
# ----------------------------------------------------------------------------
def _round_up(x, m):
    return ((x + m - 1) // m) * m


def _k_extra_pad(K):
    """Zero-pad K only when it is both large (so we want K-tiling) and misaligned."""
    if K % 128 == 0 or K <= 1024:
        return 0
    return _round_up(K, 128) - K


def _pick_k_tile(K, max_tk=1024):
    """Largest lane-aligned tile dividing K (<= max_tk); full-K single block otherwise."""
    if K % 128 != 0:
        return K                       # block dim == full array dim -> no K padding
    best = 128
    for t in range(256, min(K, max_tk) + 1, 128):
        if K % t == 0:
            best = t
    return best


# ----------------------------------------------------------------------------
# Pallas kernel: tiled  (patches @ W) + bias  [+ LeakyReLU], f32 accumulate
# ----------------------------------------------------------------------------
def _matmul_bias_act_kernel(x_ref, w_ref, b_ref, o_ref, acc_ref, *, slope):
    @pl.when(pl.program_id(2) == 0)
    def _init():
        acc_ref[...] = jnp.zeros_like(acc_ref)

    acc_ref[...] += jnp.dot(x_ref[...], w_ref[...],
                            preferred_element_type=jnp.float32)

    @pl.when(pl.program_id(2) == pl.num_programs(2) - 1)
    def _finalize():
        acc = acc_ref[...] + b_ref[...]              # (1, TN) broadcasts over rows
        if slope is not None:
            acc = jnp.where(acc >= 0.0, acc, acc * slope)
        o_ref[...] = acc.astype(o_ref.dtype)


def pallas_matmul_bias_act(patches, wmat, bias2d, slope, out_dtype):
    """patches: (M, K) bf16, wmat: (K, N) bf16, bias2d: (1, N) f32 -> (M, N) out_dtype.

    bf16 MXU operands, f32 accumulator / bias.  Grid (M, N, K) with K innermost
    ("arbitrary"); M/N are "parallel" so both TensorCores get work on megacore parts.
    M and N are NOT padded: partial edge blocks read clamped data and the garbage lanes
    / rows are never written back.  K is never padded here (the packer guarantees K is
    either lane-aligned or small enough for a single full-K block).
    """
    M, K = patches.shape
    K2, N = wmat.shape
    assert K == K2

    TM = min(512, _round_up(max(M, 1), 16))      # 16: bf16 sublane packing
    TN = min(512, _round_up(N, 128))             # lane-aligned, never below 128
    TK = _pick_k_tile(K)

    grid = (pl.cdiv(M, TM), pl.cdiv(N, TN), pl.cdiv(K, TK))

    return pl.pallas_call(
        functools.partial(_matmul_bias_act_kernel, slope=slope),
        out_shape=jax.ShapeDtypeStruct((M, N), out_dtype),
        grid_spec=pltpu.PrefetchScalarGridSpec(
            num_scalar_prefetch=0,
            grid=grid,
            in_specs=[
                pl.BlockSpec((TM, TK), lambda i, j, k: (i, k)),   # patches tile
                pl.BlockSpec((TK, TN), lambda i, j, k: (k, j)),   # weight tile
                pl.BlockSpec((1, TN), lambda i, j, k: (0, j)),    # bias tile
            ],
            out_specs=pl.BlockSpec((TM, TN), lambda i, j, k: (i, j)),
            scratch_shapes=[pltpu.VMEM((TM, TN), jnp.float32)],   # f32 accumulator
        ),
        compiler_params=pltpu.CompilerParams(
            dimension_semantics=("parallel", "parallel", "arbitrary"),
            # Worst-case working set (512x1024 bf16 LHS/RHS + 512x512 out + f32 acc,
            # double buffered) is ~6 MiB — safe on every generation including v7x.
            vmem_limit_bytes=32 * 1024 * 1024,
        ),
    )(patches, wmat, bias2d)


# ----------------------------------------------------------------------------
# Conv2d (NHWC) = lean bf16 im2col (single concat) + fused Pallas matmul kernel
# ----------------------------------------------------------------------------
def im2col_nhwc_bf16(x, KH, KW, SH, SW, PH, PW, k_extra_pad):
    """x: (B,H,W,C) bf16 -> (B*Ho*Wo, KH*KW*C + k_extra_pad) bf16 in ONE materialization."""
    B, H, W, C = x.shape
    xpad = jnp.pad(x, ((0, 0), (PH, PH), (PW, PW), (0, 0)))
    Ho = (H + 2 * PH - KH) // SH + 1
    Wo = (W + 2 * PW - KW) // SW + 1
    cols = []
    for kh in range(KH):
        for kw in range(KW):
            cols.append(
                xpad[:,
                     kh:kh + SH * (Ho - 1) + 1:SH,
                     kw:kw + SW * (Wo - 1) + 1:SW,
                     :])                              # (B, Ho, Wo, C)
    if k_extra_pad:
        cols.append(jnp.zeros((B, Ho, Wo, k_extra_pad), x.dtype))
    patches = jnp.concatenate(cols, axis=-1)          # (B, Ho, Wo, Kp) — bf16, one pass
    return patches.reshape(B * Ho * Wo, patches.shape[-1]), Ho, Wo


def conv2d_nhwc_pallas(x, layer, slope, out_dtype):
    """x: (B,H,W,Cin) bf16 NHWC.  layer holds pre-packed (Kp,Cout) bf16 weight.  NHWC out."""
    w_packed, bias2d = layer["w"], layer["b"]
    KH, KW = layer["KH"], layer["KW"]
    SH, SW = layer["stride"]
    PH, PW = layer["padding"]
    B, _, _, Cin = x.shape
    Kp, Cout = w_packed.shape
    k_extra = Kp - KH * KW * Cin
    patches, Ho, Wo = im2col_nhwc_bf16(x, KH, KW, SH, SW, PH, PW, k_extra)
    y = pallas_matmul_bias_act(patches, w_packed, bias2d, slope, out_dtype)
    return y.reshape(B, Ho, Wo, Cout)                 # stays NHWC


# ----------------------------------------------------------------------------
# Deterministic weight-norm Conv2d params, pre-packed for the kernel (once, at init)
# ----------------------------------------------------------------------------
def init_weight_norm_conv(key, out_ch, in_ch, KH, KW):
    k1, k2, k3 = jax.random.split(key, 3)
    v = 0.1 * jax.random.normal(k1, (out_ch, in_ch, KH, KW), jnp.float32)
    g = 1.0 + 0.05 * jax.random.normal(k2, (out_ch,), jnp.float32)
    b = 0.01 * jax.random.normal(k3, (out_ch,), jnp.float32)
    # weight_norm reparameterization: W = g * v / ||v||_per_out_channel
    norm = jnp.sqrt(jnp.sum(v * v, axis=(1, 2, 3), keepdims=True))
    w = g[:, None, None, None] * v / norm
    return w, b


def pack_conv(w, b, stride, padding):
    """Pre-pack weight to (K, Cout) bf16 with (kh, kw, cin)-major K, pad K if needed."""
    Cout, Cin, KH, KW = w.shape
    K = KH * KW * Cin
    wmat = jnp.transpose(w, (2, 3, 1, 0)).reshape(K, Cout)
    kpad = _k_extra_pad(K)
    if kpad:
        wmat = jnp.pad(wmat, ((0, kpad), (0, 0)))
    return dict(w=wmat.astype(jnp.bfloat16),
                b=b.astype(jnp.float32).reshape(1, Cout),
                KH=KH, KW=KW, stride=stride, padding=padding)


def make_block_params(key, in_channels, channels_list, ksize_hw, stride_hw, pad_hw):
    """Returns packed per-layer params mirroring the torch block list."""
    params = []
    prev = in_channels
    keys = jax.random.split(key, len(channels_list) + 1)
    for i, ch in enumerate(channels_list):
        w, b = init_weight_norm_conv(keys[i], ch, prev, ksize_hw[0], ksize_hw[1])
        params.append(pack_conv(w, b, stride_hw, pad_hw))
        prev = ch
    # trailing Conv2d(prev -> 1, kernel=(3,1), padding=(1,0)), no activation
    w, b = init_weight_norm_conv(keys[-1], 1, prev, 3, 1)
    params.append(pack_conv(w, b, (1, 1), (1, 0)))
    return params


def run_conv_stack(x_nhwc, params, slope, feature_maps_nchw=True):
    # bf16 compute path: cast once on the un-inflated activation, before any im2col.
    x = x_nhwc.astype(jnp.bfloat16)
    feature_maps = []
    last = len(params) - 1
    for li, layer in enumerate(params):
        is_last = li == last
        x = conv2d_nhwc_pallas(
            x, layer,
            slope=None if is_last else slope,
            out_dtype=jnp.float32 if is_last else jnp.bfloat16)
        # Torch semantics return NCHW feature maps; the transpose is only for the
        # returned list (compute path stays NHWC).  A layout-agnostic feature-matching
        # loss can pass feature_maps_nchw=False to skip these HBM passes.
        feature_maps.append(jnp.transpose(x, (0, 3, 1, 2)) if feature_maps_nchw else x)
    # Final Cout == 1, so NHWC flatten == torch's NCHW flatten.
    return x.reshape(x.shape[0], -1), feature_maps


# ----------------------------------------------------------------------------
# Period / STFT discriminator forward passes
# ----------------------------------------------------------------------------
def period_forward(audios, period, params, slope, feature_maps_nchw=True):
    B, T = audios.shape
    x = audios
    if T % period != 0:
        n_pad = period - T % period
        x = jnp.pad(x, ((0, 0), (0, n_pad)), mode="reflect")
    T2 = x.shape[1]
    x = x.reshape(B, T2 // period, period, 1)          # NHWC, C=1
    return run_conv_stack(x, params, slope, feature_maps_nchw)


def stft_forward(audios, n_fft, params, slope, feature_maps_nchw=True):
    B, T = audios.shape
    hop = n_fft // 4
    # periodic Hann window (torch.hann_window default)
    win = 0.5 - 0.5 * jnp.cos(2.0 * jnp.pi * jnp.arange(n_fft) / n_fft)
    n_frames = (T - n_fft) // hop + 1                  # center=False
    idx = jnp.arange(n_frames)[:, None] * hop + jnp.arange(n_fft)[None, :]
    frames = audios[:, idx] * win[None, None, :]       # (B, frames, n_fft)
    # TODO(synk): FFT has no Pallas TPU equivalent; the Spectrogram prenet stays in XLA.
    spec = jnp.fft.rfft(frames, axis=-1) / jnp.sqrt(jnp.sum(win * win))
    # equals torchaudio Spectrogram(..., normalized=True, center=False).permute(0,2,1)
    x = jnp.stack([jnp.real(spec), jnp.imag(spec)], axis=-1)   # (B, frames, freq, 2) NHWC
    return run_conv_stack(x, params, slope, feature_maps_nchw)


# TODO(synk): Scale_Discriminator is never instantiated by the default Discriminator
# config (use_stft_discriminator=True), so it is not implemented here.


# ----------------------------------------------------------------------------
# Full Discriminator forward
# ----------------------------------------------------------------------------
def build_discriminator_params(key, period_list, period_channels_list,
                               period_kernel_size, period_stride,
                               stft_n_fft_list, stft_channels_list,
                               stft_kernel_size, stft_stride):
    keys = jax.random.split(key, len(period_list) + len(stft_n_fft_list))
    period_params = []
    for i, _period in enumerate(period_list):
        period_params.append(make_block_params(
            keys[i], 1, period_channels_list,
            (period_kernel_size, 1), (period_stride, 1),
            ((period_kernel_size - 1) // 2, 0)))
    stft_params = []
    for j, _n_fft in enumerate(stft_n_fft_list):
        stft_params.append(make_block_params(
            keys[len(period_list) + j], 2, stft_channels_list,
            (stft_kernel_size, stft_kernel_size), (stft_stride, stft_stride),
            ((stft_kernel_size - 1) // 2, (stft_kernel_size - 1) // 2)))
    return period_params, stft_params


def discriminator_forward(audios, period_list, period_params,
                          stft_n_fft_list, stft_params, slope,
                          feature_maps_nchw=True):
    discriminations_list, feature_maps_list = [], []
    for period, params in zip(period_list, period_params):
        d, f = period_forward(audios, period, params, slope, feature_maps_nchw)
        discriminations_list.append(d)
        feature_maps_list.extend(f)
    for n_fft, params in zip(stft_n_fft_list, stft_params):
        d, f = stft_forward(audios, n_fft, params, slope, feature_maps_nchw)
        discriminations_list.append(d)
        feature_maps_list.extend(f)
    return discriminations_list, feature_maps_list


if __name__ == "__main__":
    key = jax.random.PRNGKey(0)
    k_audio, k_params = jax.random.split(key)

    # Small shapes consistent with the module (scaled-down channel/period/n_fft lists).
    B, T = 2, 250
    audios = jax.random.normal(k_audio, (B, T), jnp.float32)

    period_list = [2, 3]
    period_channels_list = [8, 16]
    period_kernel_size, period_stride = 5, 3

    stft_n_fft_list = [64, 128]
    stft_channels_list = [8, 16]
    stft_kernel_size, stft_stride = 5, 3

    leaky_relu_negative_slope = 0.1

    period_params, stft_params = build_discriminator_params(
        k_params, period_list, period_channels_list,
        period_kernel_size, period_stride,
        stft_n_fft_list, stft_channels_list,
        stft_kernel_size, stft_stride)

    # jit the whole forward: packed parameters and the static config lists are closed
    # over, so all per-layer glue + Pallas matmuls compile into one pipelined program.
    @jax.jit
    def forward(a):
        return discriminator_forward(
            a, period_list, period_params,
            stft_n_fft_list, stft_params, leaky_relu_negative_slope)

    discriminations_list, feature_maps_list = forward(audios)

    jax.block_until_ready(discriminations_list)
    jax.block_until_ready(feature_maps_list)
    print("KERNEL_OK")
</pallas_src>

<mosaic_0001>
module attributes {stable_mosaic.version = 11 : i64} {
  func.func @_matmul_bias_act_kernel(%arg0: i32, %arg1: i32, %arg2: i32, %arg3: memref<96x50xbf16, #tpu.memory_space<vmem>>, %arg4: memref<50x128xbf16, #tpu.memory_space<vmem>>, %arg5: memref<1x128xf32, #tpu.memory_space<vmem>>, %arg6: memref<96x128xbf16, #tpu.memory_space<vmem>>, %arg7: memref<96x128xf32, #tpu.memory_space<vmem>>) attributes {dimension_semantics = [#tpu.dimension_semantics<parallel>, #tpu.dimension_semantics<parallel>, #tpu.dimension_semantics<arbitrary>], iteration_bounds = array<i64: 1, 1, 1>, scalar_prefetch = 0 : i64, scratch_operands = 1 : i64, tpu.core_type = #tpu.core_type<tc>, window_params = [{transform_indices = @transform_0, window_bounds = array<i64: 96, 50>}, {transform_indices = @transform_1, window_bounds = array<i64: 50, 128>}, {transform_indices = @transform_2, window_bounds = array<i64: 1, 128>}, {transform_indices = @transform_3, window_bounds = array<i64: 96, 128>}]} {
    %c0_i32 = arith.constant 0 : i32
    %0 = arith.cmpi eq, %arg2, %c0_i32 : i32
    %1 = arith.extui %0 : i1 to i32
    %c0_i32_0 = arith.constant 0 : i32
    %2 = arith.cmpi ne, %1, %c0_i32_0 : i32
    scf.if %2 {
      %cst_10 = arith.constant 0.000000e+00 : f32
      %12 = vector.broadcast %cst_10 : f32 to vector<96x128xf32>
      %c0_11 = arith.constant 0 : index
      %c0_12 = arith.constant 0 : index
      %13 = vector.load %arg7[%c0_11, %c0_12] : memref<96x128xf32, #tpu.memory_space<vmem>>, vector<96x128xf32>
      tpu.vector_store %arg7[%c0_11, %c0_12], %12 {strides = array<i32>} : memref<96x128xf32, #tpu.memory_space<vmem>>, vector<96x128xf32>,
    } else {
    }
    %c0 = arith.constant 0 : index
    %c0_1 = arith.constant 0 : index
    %3 = vector.load %arg7[%c0, %c0_1] : memref<96x128xf32, #tpu.memory_space<vmem>>, vector<96x128xf32>
    %c0_2 = arith.constant 0 : index
    %c0_3 = arith.constant 0 : index
    %4 = vector.load %arg3[%c0_2, %c0_3] : memref<96x50xbf16, #tpu.memory_space<vmem>>, vector<96x50xbf16>
    %c0_4 = arith.constant 0 : index
    %c0_5 = arith.constant 0 : index
    %5 = vector.load %arg4[%c0_4, %c0_5] : memref<50x128xbf16, #tpu.memory_space<vmem>>, vector<50x128xbf16>
    %cst = arith.constant dense<0.000000e+00> : vector<96x128xf32>
    %6 = tpu.matmul %4, %5, %cst {dimension_numbers = #tpu.dot_dimension_numbers<[1], [0], [0], [1], [0, 0, 1, 1], [], []>} : vector<96x50xbf16>, vector<50x128xbf16>, vector<96x128xf32> -> vector<96x128xf32>
    %7 = arith.addf %3, %6 : vector<96x128xf32>
    %c0_6 = arith.constant 0 : index
    %c0_7 = arith.constant 0 : index
    %8 = vector.load %arg7[%c0_6, %c0_7] : memref<96x128xf32, #tpu.memory_space<vmem>>, vector<96x128xf32>
    tpu.vector_store %arg7[%c0_6, %c0_7], %7 {strides = array<i32>} : memref<96x128xf32, #tpu.memory_space<vmem>>, vector<96x128xf32>,
    %c0_i32_8 = arith.constant 0 : i32
    %9 = arith.cmpi eq, %arg2, %c0_i32_8 : i32
    %10 = arith.extui %9 : i1 to i32
    %c0_i32_9 = arith.constant 0 : i32
    %11 = arith.cmpi ne, %10, %c0_i32_9 : i32
    scf.if %11 {
      %c0_10 = arith.constant 0 : index
      %c0_11 = arith.constant 0 : index
      %12 = vector.load %arg7[%c0_10, %c0_11] : memref<96x128xf32, #tpu.memory_space<vmem>>, vector<96x128xf32>
      %c0_12 = arith.constant 0 : index
      %c0_13 = arith.constant 0 : index
      %13 = vector.load %arg5[%c0_12, %c0_13] : memref<1x128xf32, #tpu.memory_space<vmem>>, vector<1x128xf32>
      %14 = vector.broadcast %13 : vector<1x128xf32> to vector<96x128xf32>
      %15 = arith.addf %12, %14 : vector<96x128xf32>
      %cst_14 = arith.constant 0.000000e+00 : f32
      %16 = vector.broadcast %cst_14 : f32 to vector<96x128xf32>
      %17 = arith.cmpf oge, %15, %16 : vector<96x128xf32>
      %cst_15 = arith.constant 1.000000e-01 : f32
      %18 = vector.broadcast %cst_15 : f32 to vector<96x128xf32>
      %19 = arith.mulf %15, %18 : vector<96x128xf32>
      %20 = arith.select %17, %15, %19 : vector<96x128xi1>, vector<96x128xf32>
      %21 = arith.truncf %20 : vector<96x128xf32> to vector<96x128xbf16>
      %c0_16 = arith.constant 0 : index
      %c0_17 = arith.constant 0 : index
      %22 = vector.load %arg6[%c0_16, %c0_17] : memref<96x128xbf16, #tpu.memory_space<vmem>>, vector<96x128xbf16>
      tpu.vector_store %arg6[%c0_16, %c0_17], %21 {strides = array<i32>} : memref<96x128xbf16, #tpu.memory_space<vmem>>, vector<96x128xbf16>,
    } else {
    }
    return
  }
  func.func @transform_0(%arg0: i32, %arg1: i32, %arg2: i32) -> (i32, i32) {
    %c0_i32 = arith.constant 0 : i32
    return %arg0, %arg2 : i32, i32
  }
  func.func @transform_1(%arg0: i32, %arg1: i32, %arg2: i32) -> (i32, i32) {
    %c0_i32 = arith.constant 0 : i32
    return %arg2, %arg1 : i32, i32
  }
  func.func @transform_2(%arg0: i32, %arg1: i32, %arg2: i32) -> (i32, i32) {
    %c0_i32 = arith.constant 0 : i32
    %c0_i32_0 = arith.constant 0 : i32
    return %c0_i32, %arg1 : i32, i32
  }
  func.func @transform_3(%arg0: i32, %arg1: i32, %arg2: i32) -> (i32, i32) {
    %c0_i32 = arith.constant 0 : i32
    return %arg0, %arg1 : i32, i32
  }
}

module attributes {stable_mosaic.version = 11 : i64} {
  func.func @_matmul_bias_act_kernel(%arg0: i32, %arg1: i32, %arg2: i32, %arg3: memref<16x200xbf16, #tpu.memory_space<vmem>>, %arg4: memref<200x128xbf16, #tpu.memory_space<vmem>>, %arg5: memref<1x128xf32, #tpu.memory_space<vmem>>, %arg6: memref<16x128xbf16, #tpu.memory_space<vmem>>, %arg7: memref<16x128xf32, #tpu.memory_space<vmem>>) attributes {dimension_semantics = [#tpu.dimension_semantics<parallel>, #tpu.dimension_semantics<parallel>, #tpu.dimension_semantics<arbitrary>], iteration_bounds = array<i64: 1, 1, 1>, scalar_prefetch = 0 : i64, scratch_operands = 1 : i64, tpu.core_type = #tpu.core_type<tc>, window_params = [{transform_indices = @transform_0, window_bounds = array<i64: 16, 200>}, {transform_indices = @transform_1, window_bounds = array<i64: 200, 128>}, {transform_indices = @transform_2, window_bounds = array<i64: 1, 128>}, {transform_indices = @transform_3, window_bounds = array<i64: 16, 128>}]} {
    %c0_i32 = arith.constant 0 : i32
    %0 = arith.cmpi eq, %arg2, %c0_i32 : i32
    %1 = arith.extui %0 : i1 to i32
    %c0_i32_0 = arith.constant 0 : i32
    %2 = arith.cmpi ne, %1, %c0_i32_0 : i32
    scf.if %2 {
      %cst_10 = arith.constant 0.000000e+00 : f32
      %12 = vector.broadcast %cst_10 : f32 to vector<16x128xf32>
      %c0_11 = arith.constant 0 : index
      %c0_12 = arith.constant 0 : index
      %13 = vector.load %arg7[%c0_11, %c0_12] : memref<16x128xf32, #tpu.memory_space<vmem>>, vector<16x128xf32>
      tpu.vector_store %arg7[%c0_11, %c0_12], %12 {strides = array<i32>} : memref<16x128xf32, #tpu.memory_space<vmem>>, vector<16x128xf32>,
    } else {
    }
    %c0 = arith.constant 0 : index
    %c0_1 = arith.constant 0 : index
    %3 = vector.load %arg7[%c0, %c0_1] : memref<16x128xf32, #tpu.memory_space<vmem>>, vector<16x128xf32>
    %c0_2 = arith.constant 0 : index
    %c0_3 = arith.constant 0 : index
    %4 = vector.load %arg3[%c0_2, %c0_3] : memref<16x200xbf16, #tpu.memory_space<vmem>>, vector<16x200xbf16>
    %c0_4 = arith.constant 0 : index
    %c0_5 = arith.constant 0 : index
    %5 = vector.load %arg4[%c0_4, %c0_5] : memref<200x128xbf16, #tpu.memory_space<vmem>>, vector<200x128xbf16>
    %cst = arith.constant dense<0.000000e+00> : vector<16x128xf32>
    %6 = tpu.matmul %4, %5, %cst {dimension_numbers = #tpu.dot_dimension_numbers<[1], [0], [0], [1], [0, 0, 1, 1], [], []>} : vector<16x200xbf16>, vector<200x128xbf16>, vector<16x128xf32> -> vector<16x128xf32>
    %7 = arith.addf %3, %6 : vector<16x128xf32>
    %c0_6 = arith.constant 0 : index
    %c0_7 = arith.constant 0 : index
    %8 = vector.load %arg7[%c0_6, %c0_7] : memref<16x128xf32, #tpu.memory_space<vmem>>, vector<16x128xf32>
    tpu.vector_store %arg7[%c0_6, %c0_7], %7 {strides = array<i32>} : memref<16x128xf32, #tpu.memory_space<vmem>>, vector<16x128xf32>,
    %c0_i32_8 = arith.constant 0 : i32
    %9 = arith.cmpi eq, %arg2, %c0_i32_8 : i32
    %10 = arith.extui %9 : i1 to i32
    %c0_i32_9 = arith.constant 0 : i32
    %11 = arith.cmpi ne, %10, %c0_i32_9 : i32
    scf.if %11 {
      %c0_10 = arith.constant 0 : index
      %c0_11 = arith.constant 0 : index
      %12 = vector.load %arg7[%c0_10, %c0_11] : memref<16x128xf32, #tpu.memory_space<vmem>>, vector<16x128xf32>
      %c0_12 = arith.constant 0 : index
      %c0_13 = arith.constant 0 : index
      %13 = vector.load %arg5[%c0_12, %c0_13] : memref<1x128xf32, #tpu.memory_space<vmem>>, vector<1x128xf32>
      %14 = vector.broadcast %13 : vector<1x128xf32> to vector<16x128xf32>
      %15 = arith.addf %12, %14 : vector<16x128xf32>
      %cst_14 = arith.constant 0.000000e+00 : f32
      %16 = vector.broadcast %cst_14 : f32 to vector<16x128xf32>
      %17 = arith.cmpf oge, %15, %16 : vector<16x128xf32>
      %cst_15 = arith.constant 1.000000e-01 : f32
      %18 = vector.broadcast %cst_15 : f32 to vector<16x128xf32>
      %19 = arith.mulf %15, %18 : vector<16x128xf32>
      %20 = arith.select %17, %15, %19 : vector<16x128xi1>, vector<16x128xf32>
      %21 = arith.truncf %20 : vector<16x128xf32> to vector<16x128xbf16>
      %c0_16 = arith.constant 0 : index
      %c0_17 = arith.constant 0 : index
      %22 = vector.load %arg6[%c0_16, %c0_17] : memref<16x128xbf16, #tpu.memory_space<vmem>>, vector<16x128xbf16>
      tpu.vector_store %arg6[%c0_16, %c0_17], %21 {strides = array<i32>} : memref<16x128xbf16, #tpu.memory_space<vmem>>, vector<16x128xbf16>,
    } else {
    }
    return
  }
  func.func @transform_0(%arg0: i32, %arg1: i32, %arg2: i32) -> (i32, i32) {
    %c0_i32 = arith.constant 0 : i32
    return %arg0, %arg2 : i32, i32
  }
  func.func @transform_1(%arg0: i32, %arg1: i32, %arg2: i32) -> (i32, i32) {
    %c0_i32 = arith.constant 0 : i32
    return %arg2, %arg1 : i32, i32
  }
  func.func @transform_2(%arg0: i32, %arg1: i32, %arg2: i32) -> (i32, i32) {
    %c0_i32 = arith.constant 0 : i32
    %c0_i32_0 = arith.constant 0 : i32
    return %c0_i32, %arg1 : i32, i32
  }
  func.func @transform_3(%arg0: i32, %arg1: i32, %arg2: i32) -> (i32, i32) {
    %c0_i32 = arith.constant 0 : i32
    return %arg0, %arg1 : i32, i32
  }
}

module attributes {stable_mosaic.version = 11 : i64} {
  func.func @_matmul_bias_act_kernel(%arg0: i32, %arg1: i32, %arg2: i32, %arg3: memref<16x48xbf16, #tpu.memory_space<vmem>>, %arg4: memref<48x128xbf16, #tpu.memory_space<vmem>>, %arg5: memref<1x128xf32, #tpu.memory_space<vmem>>, %arg6: memref<16x128xf32, #tpu.memory_space<vmem>>, %arg7: memref<16x128xf32, #tpu.memory_space<vmem>>) attributes {dimension_semantics = [#tpu.dimension_semantics<parallel>, #tpu.dimension_semantics<parallel>, #tpu.dimension_semantics<arbitrary>], iteration_bounds = array<i64: 1, 1, 1>, scalar_prefetch = 0 : i64, scratch_operands = 1 : i64, tpu.core_type = #tpu.core_type<tc>, window_params = [{transform_indices = @transform_0, window_bounds = array<i64: 16, 48>}, {transform_indices = @transform_1, window_bounds = array<i64: 48, 128>}, {transform_indices = @transform_2, window_bounds = array<i64: 1, 128>}, {transform_indices = @transform_3, window_bounds = array<i64: 16, 128>}]} {
    %c0_i32 = arith.constant 0 : i32
    %0 = arith.cmpi eq, %arg2, %c0_i32 : i32
    %1 = arith.extui %0 : i1 to i32
    %c0_i32_0 = arith.constant 0 : i32
    %2 = arith.cmpi ne, %1, %c0_i32_0 : i32
    scf.if %2 {
      %cst_10 = arith.constant 0.000000e+00 : f32
      %12 = vector.broadcast %cst_10 : f32 to vector<16x128xf32>
      %c0_11 = arith.constant 0 : index
      %c0_12 = arith.constant 0 : index
      %13 = vector.load %arg7[%c0_11, %c0_12] : memref<16x128xf32, #tpu.memory_space<vmem>>, vector<16x128xf32>
      tpu.vector_store %arg7[%c0_11, %c0_12], %12 {strides = array<i32>} : memref<16x128xf32, #tpu.memory_space<vmem>>, vector<16x128xf32>,
    } else {
    }
    %c0 = arith.constant 0 : index
    %c0_1 = arith.constant 0 : index
    %3 = vector.load %arg7[%c0, %c0_1] : memref<16x128xf32, #tpu.memory_space<vmem>>, vector<16x128xf32>
    %c0_2 = arith.constant 0 : index
    %c0_3 = arith.constant 0 : index
    %4 = vector.load %arg3[%c0_2, %c0_3] : memref<16x48xbf16, #tpu.memory_space<vmem>>, vector<16x48xbf16>
    %c0_4 = arith.constant 0 : index
    %c0_5 = arith.constant 0 : index
    %5 = vector.load %arg4[%c0_4, %c0_5] : memref<48x128xbf16, #tpu.memory_space<vmem>>, vector<48x128xbf16>
    %cst = arith.constant dense<0.000000e+00> : vector<16x128xf32>
    %6 = tpu.matmul %4, %5, %cst {dimension_numbers = #tpu.dot_dimension_numbers<[1], [0], [0], [1], [0, 0, 1, 1], [], []>} : vector<16x48xbf16>, vector<48x128xbf16>, vector<16x128xf32> -> vector<16x128xf32>
    %7 = arith.addf %3, %6 : vector<16x128xf32>
    %c0_6 = arith.constant 0 : index
    %c0_7 = arith.constant 0 : index
    %8 = vector.load %arg7[%c0_6, %c0_7] : memref<16x128xf32, #tpu.memory_space<vmem>>, vector<16x128xf32>
    tpu.vector_store %arg7[%c0_6, %c0_7], %7 {strides = array<i32>} : memref<16x128xf32, #tpu.memory_space<vmem>>, vector<16x128xf32>,
    %c0_i32_8 = arith.constant 0 : i32
    %9 = arith.cmpi eq, %arg2, %c0_i32_8 : i32
    %10 = arith.extui %9 : i1 to i32
    %c0_i32_9 = arith.constant 0 : i32
    %11 = arith.cmpi ne, %10, %c0_i32_9 : i32
    scf.if %11 {
      %c0_10 = arith.constant 0 : index
      %c0_11 = arith.constant 0 : index
      %12 = vector.load %arg7[%c0_10, %c0_11] : memref<16x128xf32, #tpu.memory_space<vmem>>, vector<16x128xf32>
      %c0_12 = arith.constant 0 : index
      %c0_13 = arith.constant 0 : index
      %13 = vector.load %arg5[%c0_12, %c0_13] : memref<1x128xf32, #tpu.memory_space<vmem>>, vector<1x128xf32>
      %14 = vector.broadcast %13 : vector<1x128xf32> to vector<16x128xf32>
      %15 = arith.addf %12, %14 : vector<16x128xf32>
      %c0_14 = arith.constant 0 : index
      %c0_15 = arith.constant 0 : index
      %16 = vector.load %arg6[%c0_14, %c0_15] : memref<16x128xf32, #tpu.memory_space<vmem>>, vector<16x128xf32>
      tpu.vector_store %arg6[%c0_14, %c0_15], %15 {strides = array<i32>} : memref<16x128xf32, #tpu.memory_space<vmem>>, vector<16x128xf32>,
    } else {
    }
    return
  }
  func.func @transform_0(%arg0: i32, %arg1: i32, %arg2: i32) -> (i32, i32) {
    %c0_i32 = arith.constant 0 : i32
    return %arg0, %arg2 : i32, i32
  }
  func.func @transform_1(%arg0: i32, %arg1: i32, %arg2: i32) -> (i32, i32) {
    %c0_i32 = arith.constant 0 : i32
    return %arg2, %arg1 : i32, i32
  }
  func.func @transform_2(%arg0: i32, %arg1: i32, %arg2: i32) -> (i32, i32) {
    %c0_i32 = arith.constant 0 : i32
    %c0_i32_0 = arith.constant 0 : i32
    return %c0_i32, %arg1 : i32, i32
  }
  func.func @transform_3(%arg0: i32, %arg1: i32, %arg2: i32) -> (i32, i32) {
    %c0_i32 = arith.constant 0 : i32
    return %arg0, %arg1 : i32, i32
  }
}

module attributes {stable_mosaic.version = 11 : i64} {
  func.func @_matmul_bias_act_kernel(%arg0: i32, %arg1: i32, %arg2: i32, %arg3: memref<176x5xbf16, #tpu.memory_space<vmem>>, %arg4: memref<5x128xbf16, #tpu.memory_space<vmem>>, %arg5: memref<1x128xf32, #tpu.memory_space<vmem>>, %arg6: memref<176x128xbf16, #tpu.memory_space<vmem>>, %arg7: memref<176x128xf32, #tpu.memory_space<vmem>>) attributes {dimension_semantics = [#tpu.dimension_semantics<parallel>, #tpu.dimension_semantics<parallel>, #tpu.dimension_semantics<arbitrary>], iteration_bounds = array<i64: 1, 1, 1>, scalar_prefetch = 0 : i64, scratch_operands = 1 : i64, tpu.core_type = #tpu.core_type<tc>, window_params = [{transform_indices = @transform_0, window_bounds = array<i64: 176, 5>}, {transform_indices = @transform_1, window_bounds = array<i64: 5, 128>}, {transform_indices = @transform_2, window_bounds = array<i64: 1, 128>}, {transform_indices = @transform_3, window_bounds = array<i64: 176, 128>}]} {
    %c0_i32 = arith.constant 0 : i32
    %0 = arith.cmpi eq, %arg2, %c0_i32 : i32
    %1 = arith.extui %0 : i1 to i32
    %c0_i32_0 = arith.constant 0 : i32
    %2 = arith.cmpi ne, %1, %c0_i32_0 : i32
    scf.if %2 {
      %cst_10 = arith.constant 0.000000e+00 : f32
      %12 = vector.broadcast %cst_10 : f32 to vector<176x128xf32>
      %c0_11 = arith.constant 0 : index
      %c0_12 = arith.constant 0 : index
      %13 = vector.load %arg7[%c0_11, %c0_12] : memref<176x128xf32, #tpu.memory_space<vmem>>, vector<176x128xf32>
      tpu.vector_store %arg7[%c0_11, %c0_12], %12 {strides = array<i32>} : memref<176x128xf32, #tpu.memory_space<vmem>>, vector<176x128xf32>,
    } else {
    }
    %c0 = arith.constant 0 : index
    %c0_1 = arith.constant 0 : index
    %3 = vector.load %arg7[%c0, %c0_1] : memref<176x128xf32, #tpu.memory_space<vmem>>, vector<176x128xf32>
    %c0_2 = arith.constant 0 : index
    %c0_3 = arith.constant 0 : index
    %4 = vector.load %arg3[%c0_2, %c0_3] : memref<176x5xbf16, #tpu.memory_space<vmem>>, vector<176x5xbf16>
    %c0_4 = arith.constant 0 : index
    %c0_5 = arith.constant 0 : index
    %5 = vector.load %arg4[%c0_4, %c0_5] : memref<5x128xbf16, #tpu.memory_space<vmem>>, vector<5x128xbf16>
    %cst = arith.constant dense<0.000000e+00> : vector<176x128xf32>
    %6 = tpu.matmul %4, %5, %cst {dimension_numbers = #tpu.dot_dimension_numbers<[1], [0], [0], [1], [0, 0, 1, 1], [], []>} : vector<176x5xbf16>, vector<5x128xbf16>, vector<176x128xf32> -> vector<176x128xf32>
    %7 = arith.addf %3, %6 : vector<176x128xf32>
    %c0_6 = arith.constant 0 : index
    %c0_7 = arith.constant 0 : index
    %8 = vector.load %arg7[%c0_6, %c0_7] : memref<176x128xf32, #tpu.memory_space<vmem>>, vector<176x128xf32>
    tpu.vector_store %arg7[%c0_6, %c0_7], %7 {strides = array<i32>} : memref<176x128xf32, #tpu.memory_space<vmem>>, vector<176x128xf32>,
    %c0_i32_8 = arith.constant 0 : i32
    %9 = arith.cmpi eq, %arg2, %c0_i32_8 : i32
    %10 = arith.extui %9 : i1 to i32
    %c0_i32_9 = arith.constant 0 : i32
    %11 = arith.cmpi ne, %10, %c0_i32_9 : i32
    scf.if %11 {
      %c0_10 = arith.constant 0 : index
      %c0_11 = arith.constant 0 : index
      %12 = vector.load %arg7[%c0_10, %c0_11] : memref<176x128xf32, #tpu.memory_space<vmem>>, vector<176x128xf32>
      %c0_12 = arith.constant 0 : index
      %c0_13 = arith.constant 0 : index
      %13 = vector.load %arg5[%c0_12, %c0_13] : memref<1x128xf32, #tpu.memory_space<vmem>>, vector<1x128xf32>
      %14 = vector.broadcast %13 : vector<1x128xf32> to vector<176x128xf32>
      %15 = arith.addf %12, %14 : vector<176x128xf32>
      %cst_14 = arith.constant 0.000000e+00 : f32
      %16 = vector.broadcast %cst_14 : f32 to vector<176x128xf32>
      %17 = arith.cmpf oge, %15, %16 : vector<176x128xf32>
      %cst_15 = arith.constant 1.000000e-01 : f32
      %18 = vector.broadcast %cst_15 : f32 to vector<176x128xf32>
      %19 = arith.mulf %15, %18 : vector<176x128xf32>
      %20 = arith.select %17, %15, %19 : vector<176x128xi1>, vector<176x128xf32>
      %21 = arith.truncf %20 : vector<176x128xf32> to vector<176x128xbf16>
      %c0_16 = arith.constant 0 : index
      %c0_17 = arith.constant 0 : index
      %22 = vector.load %arg6[%c0_16, %c0_17] : memref<176x128xbf16, #tpu.memory_space<vmem>>, vector<176x128xbf16>
      tpu.vector_store %arg6[%c0_16, %c0_17], %21 {strides = array<i32>} : memref<176x128xbf16, #tpu.memory_space<vmem>>, vector<176x128xbf16>,
    } else {
    }
    return
  }
  func.func @transform_0(%arg0: i32, %arg1: i32, %arg2: i32) -> (i32, i32) {
    %c0_i32 = arith.constant 0 : i32
    return %arg0, %arg2 : i32, i32
  }
  func.func @transform_1(%arg0: i32, %arg1: i32, %arg2: i32) -> (i32, i32) {
    %c0_i32 = arith.constant 0 : i32
    return %arg2, %arg1 : i32, i32
  }
  func.func @transform_2(%arg0: i32, %arg1: i32, %arg2: i32) -> (i32, i32) {
    %c0_i32 = arith.constant 0 : i32
    %c0_i32_0 = arith.constant 0 : i32
    return %c0_i32, %arg1 : i32, i32
  }
  func.func @transform_3(%arg0: i32, %arg1: i32, %arg2: i32) -> (i32, i32) {
    %c0_i32 = arith.constant 0 : i32
    return %arg0, %arg1 : i32, i32
  }
}

module attributes {stable_mosaic.version = 11 : i64} {
  func.func @_matmul_bias_act_kernel(%arg0: i32, %arg1: i32, %arg2: i32, %arg3: memref<64x40xbf16, #tpu.memory_space<vmem>>, %arg4: memref<40x128xbf16, #tpu.memory_space<vmem>>, %arg5: memref<1x128xf32, #tpu.memory_space<vmem>>, %arg6: memref<64x128xbf16, #tpu.memory_space<vmem>>, %arg7: memref<64x128xf32, #tpu.memory_space<vmem>>) attributes {dimension_semantics = [#tpu.dimension_semantics<parallel>, #tpu.dimension_semantics<parallel>, #tpu.dimension_semantics<arbitrary>], iteration_bounds = array<i64: 1, 1, 1>, scalar_prefetch = 0 : i64, scratch_operands = 1 : i64, tpu.core_type = #tpu.core_type<tc>, window_params = [{transform_indices = @transform_0, window_bounds = array<i64: 64, 40>}, {transform_indices = @transform_1, window_bounds = array<i64: 40, 128>}, {transform_indices = @transform_2, window_bounds = array<i64: 1, 128>}, {transform_indices = @transform_3, window_bounds = array<i64: 64, 128>}]} {
    %c0_i32 = arith.constant 0 : i32
    %0 = arith.cmpi eq, %arg2, %c0_i32 : i32
    %1 = arith.extui %0 : i1 to i32
    %c0_i32_0 = arith.constant 0 : i32
    %2 = arith.cmpi ne, %1, %c0_i32_0 : i32
    scf.if %2 {
      %cst_10 = arith.constant 0.000000e+00 : f32
      %12 = vector.broadcast %cst_10 : f32 to vector<64x128xf32>
      %c0_11 = arith.constant 0 : index
      %c0_12 = arith.constant 0 : index
      %13 = vector.load %arg7[%c0_11, %c0_12] : memref<64x128xf32, #tpu.memory_space<vmem>>, vector<64x128xf32>
      tpu.vector_store %arg7[%c0_11, %c0_12], %12 {strides = array<i32>} : memref<64x128xf32, #tpu.memory_space<vmem>>, vector<64x128xf32>,
    } else {
    }
    %c0 = arith.constant 0 : index
    %c0_1 = arith.constant 0 : index
    %3 = vector.load %arg7[%c0, %c0_1] : memref<64x128xf32, #tpu.memory_space<vmem>>, vector<64x128xf32>
    %c0_2 = arith.constant 0 : index
    %c0_3 = arith.constant 0 : index
    %4 = vector.load %arg3[%c0_2, %c0_3] : memref<64x40xbf16, #tpu.memory_space<vmem>>, vector<64x40xbf16>
    %c0_4 = arith.constant 0 : index
    %c0_5 = arith.constant 0 : index
    %5 = vector.load %arg4[%c0_4, %c0_5] : memref<40x128xbf16, #tpu.memory_space<vmem>>, vector<40x128xbf16>
    %cst = arith.constant dense<0.000000e+00> : vector<64x128xf32>
    %6 = tpu.matmul %4, %5, %cst {dimension_numbers = #tpu.dot_dimension_numbers<[1], [0], [0], [1], [0, 0, 1, 1], [], []>} : vector<64x40xbf16>, vector<40x128xbf16>, vector<64x128xf32> -> vector<64x128xf32>
    %7 = arith.addf %3, %6 : vector<64x128xf32>
    %c0_6 = arith.constant 0 : index
    %c0_7 = arith.constant 0 : index
    %8 = vector.load %arg7[%c0_6, %c0_7] : memref<64x128xf32, #tpu.memory_space<vmem>>, vector<64x128xf32>
    tpu.vector_store %arg7[%c0_6, %c0_7], %7 {strides = array<i32>} : memref<64x128xf32, #tpu.memory_space<vmem>>, vector<64x128xf32>,
    %c0_i32_8 = arith.constant 0 : i32
    %9 = arith.cmpi eq, %arg2, %c0_i32_8 : i32
    %10 = arith.extui %9 : i1 to i32
    %c0_i32_9 = arith.constant 0 : i32
    %11 = arith.cmpi ne, %10, %c0_i32_9 : i32
    scf.if %11 {
      %c0_10 = arith.constant 0 : index
      %c0_11 = arith.constant 0 : index
      %12 = vector.load %arg7[%c0_10, %c0_11] : memref<64x128xf32, #tpu.memory_space<vmem>>, vector<64x128xf32>
      %c0_12 = arith.constant 0 : index
      %c0_13 = arith.constant 0 : index
      %13 = vector.load %arg5[%c0_12, %c0_13] : memref<1x128xf32, #tpu.memory_space<vmem>>, vector<1x128xf32>
      %14 = vector.broadcast %13 : vector<1x128xf32> to vector<64x128xf32>
      %15 = arith.addf %12, %14 : vector<64x128xf32>
      %cst_14 = arith.constant 0.000000e+00 : f32
      %16 = vector.broadcast %cst_14 : f32 to vector<64x128xf32>
      %17 = arith.cmpf oge, %15, %16 : vector<64x128xf32>
      %cst_15 = arith.constant 1.000000e-01 : f32
      %18 = vector.broadcast %cst_15 : f32 to vector<64x128xf32>
      %19 = arith.mulf %15, %18 : vector<64x128xf32>
      %20 = arith.select %17, %15, %19 : vector<64x128xi1>, vector<64x128xf32>
      %21 = arith.truncf %20 : vector<64x128xf32> to vector<64x128xbf16>
      %c0_16 = arith.constant 0 : index
      %c0_17 = arith.constant 0 : index
      %22 = vector.load %arg6[%c0_16, %c0_17] : memref<64x128xbf16, #tpu.memory_space<vmem>>, vector<64x128xbf16>
      tpu.vector_store %arg6[%c0_16, %c0_17], %21 {strides = array<i32>} : memref<64x128xbf16, #tpu.memory_space<vmem>>, vector<64x128xbf16>,
    } else {
    }
    return
  }
  func.func @transform_0(%arg0: i32, %arg1: i32, %arg2: i32) -> (i32, i32) {
    %c0_i32 = arith.constant 0 : i32
    return %arg0, %arg2 : i32, i32
  }
  func.func @transform_1(%arg0: i32, %arg1: i32, %arg2: i32) -> (i32, i32) {
    %c0_i32 = arith.constant 0 : i32
    return %arg2, %arg1 : i32, i32
  }
  func.func @transform_2(%arg0: i32, %arg1: i32, %arg2: i32) -> (i32, i32) {
    %c0_i32 = arith.constant 0 : i32
    %c0_i32_0 = arith.constant 0 : i32
    return %c0_i32, %arg1 : i32, i32
  }
  func.func @transform_3(%arg0: i32, %arg1: i32, %arg2: i32) -> (i32, i32) {
    %c0_i32 = arith.constant 0 : i32
    return %arg0, %arg1 : i32, i32
  }
}

module attributes {stable_mosaic.version = 11 : i64} {
  func.func @_matmul_bias_act_kernel(%arg0: i32, %arg1: i32, %arg2: i32, %arg3: memref<64x48xbf16, #tpu.memory_space<vmem>>, %arg4: memref<48x128xbf16, #tpu.memory_space<vmem>>, %arg5: memref<1x128xf32, #tpu.memory_space<vmem>>, %arg6: memref<64x128xf32, #tpu.memory_space<vmem>>, %arg7: memref<64x128xf32, #tpu.memory_space<vmem>>) attributes {dimension_semantics = [#tpu.dimension_semantics<parallel>, #tpu.dimension_semantics<parallel>, #tpu.dimension_semantics<arbitrary>], iteration_bounds = array<i64: 1, 1, 1>, scalar_prefetch = 0 : i64, scratch_operands = 1 : i64, tpu.core_type = #tpu.core_type<tc>, window_params = [{transform_indices = @transform_0, window_bounds = array<i64: 64, 48>}, {transform_indices = @transform_1, window_bounds = array<i64: 48, 128>}, {transform_indices = @transform_2, window_bounds = array<i64: 1, 128>}, {transform_indices = @transform_3, window_bounds = array<i64: 64, 128>}]} {
    %c0_i32 = arith.constant 0 : i32
    %0 = arith.cmpi eq, %arg2, %c0_i32 : i32
    %1 = arith.extui %0 : i1 to i32
    %c0_i32_0 = arith.constant 0 : i32
    %2 = arith.cmpi ne, %1, %c0_i32_0 : i32
    scf.if %2 {
      %cst_10 = arith.constant 0.000000e+00 : f32
      %12 = vector.broadcast %cst_10 : f32 to vector<64x128xf32>
      %c0_11 = arith.constant 0 : index
      %c0_12 = arith.constant 0 : index
      %13 = vector.load %arg7[%c0_11, %c0_12] : memref<64x128xf32, #tpu.memory_space<vmem>>, vector<64x128xf32>
      tpu.vector_store %arg7[%c0_11, %c0_12], %12 {strides = array<i32>} : memref<64x128xf32, #tpu.memory_space<vmem>>, vector<64x128xf32>,
    } else {
    }
    %c0 = arith.constant 0 : index
    %c0_1 = arith.constant 0 : index
    %3 = vector.load %arg7[%c0, %c0_1] : memref<64x128xf32, #tpu.memory_space<vmem>>, vector<64x128xf32>
    %c0_2 = arith.constant 0 : index
    %c0_3 = arith.constant 0 : index
    %4 = vector.load %arg3[%c0_2, %c0_3] : memref<64x48xbf16, #tpu.memory_space<vmem>>, vector<64x48xbf16>
    %c0_4 = arith.constant 0 : index
    %c0_5 = arith.constant 0 : index
    %5 = vector.load %arg4[%c0_4, %c0_5] : memref<48x128xbf16, #tpu.memory_space<vmem>>, vector<48x128xbf16>
    %cst = arith.constant dense<0.000000e+00> : vector<64x128xf32>
    %6 = tpu.matmul %4, %5, %cst {dimension_numbers = #tpu.dot_dimension_numbers<[1], [0], [0], [1], [0, 0, 1, 1], [], []>} : vector<64x48xbf16>, vector<48x128xbf16>, vector<64x128xf32> -> vector<64x128xf32>
    %7 = arith.addf %3, %6 : vector<64x128xf32>
    %c0_6 = arith.constant 0 : index
    %c0_7 = arith.constant 0 : index
    %8 = vector.load %arg7[%c0_6, %c0_7] : memref<64x128xf32, #tpu.memory_space<vmem>>, vector<64x128xf32>
    tpu.vector_store %arg7[%c0_6, %c0_7], %7 {strides = array<i32>} : memref<64x128xf32, #tpu.memory_space<vmem>>, vector<64x128xf32>,
    %c0_i32_8 = arith.constant 0 : i32
    %9 = arith.cmpi eq, %arg2, %c0_i32_8 : i32
    %10 = arith.extui %9 : i1 to i32
    %c0_i32_9 = arith.constant 0 : i32
    %11 = arith.cmpi ne, %10, %c0_i32_9 : i32
    scf.if %11 {
      %c0_10 = arith.constant 0 : index
      %c0_11 = arith.constant 0 : index
      %12 = vector.load %arg7[%c0_10, %c0_11] : memref<64x128xf32, #tpu.memory_space<vmem>>, vector<64x128xf32>
      %c0_12 = arith.constant 0 : index
      %c0_13 = arith.constant 0 : index
      %13 = vector.load %arg5[%c0_12, %c0_13] : memref<1x128xf32, #tpu.memory_space<vmem>>, vector<1x128xf32>
      %14 = vector.broadcast %13 : vector<1x128xf32> to vector<64x128xf32>
      %15 = arith.addf %12, %14 : vector<64x128xf32>
      %c0_14 = arith.constant 0 : index
      %c0_15 = arith.constant 0 : index
      %16 = vector.load %arg6[%c0_14, %c0_15] : memref<64x128xf32, #tpu.memory_space<vmem>>, vector<64x128xf32>
      tpu.vector_store %arg6[%c0_14, %c0_15], %15 {strides = array<i32>} : memref<64x128xf32, #tpu.memory_space<vmem>>, vector<64x128xf32>,
    } else {
    }
    return
  }
  func.func @transform_0(%arg0: i32, %arg1: i32, %arg2: i32) -> (i32, i32) {
    %c0_i32 = arith.constant 0 : i32
    return %arg0, %arg2 : i32, i32
  }
  func.func @transform_1(%arg0: i32, %arg1: i32, %arg2: i32) -> (i32, i32) {
    %c0_i32 = arith.constant 0 : i32
    return %arg2, %arg1 : i32, i32
  }
  func.func @transform_2(%arg0: i32, %arg1: i32, %arg2: i32) -> (i32, i32) {
    %c0_i32 = arith.constant 0 : i32
    %c0_i32_0 = arith.constant 0 : i32
    return %c0_i32, %arg1 : i32, i32
  }
  func.func @transform_3(%arg0: i32, %arg1: i32, %arg2: i32) -> (i32, i32) {
    %c0_i32 = arith.constant 0 : i32
    return %arg0, %arg1 : i32, i32
  }
}

module attributes {stable_mosaic.version = 11 : i64} {
  func.func @_matmul_bias_act_kernel(%arg0: i32, %arg1: i32, %arg2: i32, %arg3: memref<64x40xbf16, #tpu.memory_space<vmem>>, %arg4: memref<40x128xbf16, #tpu.memory_space<vmem>>, %arg5: memref<1x128xf32, #tpu.memory_space<vmem>>, %arg6: memref<64x128xbf16, #tpu.memory_space<vmem>>, %arg7: memref<64x128xf32, #tpu.memory_space<vmem>>) attributes {dimension_semantics = [#tpu.dimension_semantics<parallel>, #tpu.dimension_semantics<parallel>, #tpu.dimension_semantics<arbitrary>], iteration_bounds = array<i64: 1, 1, 1>, scalar_prefetch = 0 : i64, scratch_operands = 1 : i64, tpu.core_type = #tpu.core_type<tc>, window_params = [{transform_indices = @transform_0, window_bounds = array<i64: 64, 40>}, {transform_indices = @transform_1, window_bounds = array<i64: 40, 128>}, {transform_indices = @transform_2, window_bounds = array<i64: 1, 128>}, {transform_indices = @transform_3, window_bounds = array<i64: 64, 128>}]} {
    %c0_i32 = arith.constant 0 : i32
    %0 = arith.cmpi eq, %arg2, %c0_i32 : i32
    %1 = arith.extui %0 : i1 to i32
    %c0_i32_0 = arith.constant 0 : i32
    %2 = arith.cmpi ne, %1, %c0_i32_0 : i32
    scf.if %2 {
      %cst_10 = arith.constant 0.000000e+00 : f32
      %12 = vector.broadcast %cst_10 : f32 to vector<64x128xf32>
      %c0_11 = arith.constant 0 : index
      %c0_12 = arith.constant 0 : index
      %13 = vector.load %arg7[%c0_11, %c0_12] : memref<64x128xf32, #tpu.memory_space<vmem>>, vector<64x128xf32>
      tpu.vector_store %arg7[%c0_11, %c0_12], %12 {strides = array<i32>} : memref<64x128xf32, #tpu.memory_space<vmem>>, vector<64x128xf32>,
    } else {
    }
    %c0 = arith.constant 0 : index
    %c0_1 = arith.constant 0 : index
    %3 = vector.load %arg7[%c0, %c0_1] : memref<64x128xf32, #tpu.memory_space<vmem>>, vector<64x128xf32>
    %c0_2 = arith.constant 0 : index
    %c0_3 = arith.constant 0 : index
    %4 = vector.load %arg3[%c0_2, %c0_3] : memref<64x40xbf16, #tpu.memory_space<vmem>>, vector<64x40xbf16>
    %c0_4 = arith.constant 0 : index
    %c0_5 = arith.constant 0 : index
    %5 = vector.load %arg4[%c0_4, %c0_5] : memref<40x128xbf16, #tpu.memory_space<vmem>>, vector<40x128xbf16>
    %cst = arith.constant dense<0.000000e+00> : vector<64x128xf32>
    %6 = tpu.matmul %4, %5, %cst {dimension_numbers = #tpu.dot_dimension_numbers<[1], [0], [0], [1], [0, 0, 1, 1], [], []>} : vector<64x40xbf16>, vector<40x128xbf16>, vector<64x128xf32> -> vector<64x128xf32>
    %7 = arith.addf %3, %6 : vector<64x128xf32>
    %c0_6 = arith.constant 0 : index
    %c0_7 = arith.constant 0 : index
    %8 = vector.load %arg7[%c0_6, %c0_7] : memref<64x128xf32, #tpu.memory_space<vmem>>, vector<64x128xf32>
    tpu.vector_store %arg7[%c0_6, %c0_7], %7 {strides = array<i32>} : memref<64x128xf32, #tpu.memory_space<vmem>>, vector<64x128xf32>,
    %c0_i32_8 = arith.constant 0 : i32
    %9 = arith.cmpi eq, %arg2, %c0_i32_8 : i32
    %10 = arith.extui %9 : i1 to i32
    %c0_i32_9 = arith.constant 0 : i32
    %11 = arith.cmpi ne, %10, %c0_i32_9 : i32
    scf.if %11 {
      %c0_10 = arith.constant 0 : index
      %c0_11 = arith.constant 0 : index
      %12 = vector.load %arg7[%c0_10, %c0_11] : memref<64x128xf32, #tpu.memory_space<vmem>>, vector<64x128xf32>
      %c0_12 = arith.constant 0 : index
      %c0_13 = arith.constant 0 : index
      %13 = vector.load %arg5[%c0_12, %c0_13] : memref<1x128xf32, #tpu.memory_space<vmem>>, vector<1x128xf32>
      %14 = vector.broadcast %13 : vector<1x128xf32> to vector<64x128xf32>
      %15 = arith.addf %12, %14 : vector<64x128xf32>
      %cst_14 = arith.constant 0.000000e+00 : f32
      %16 = vector.broadcast %cst_14 : f32 to vector<64x128xf32>
      %17 = arith.cmpf oge, %15, %16 : vector<64x128xf32>
      %cst_15 = arith.constant 1.000000e-01 : f32
      %18 = vector.broadcast %cst_15 : f32 to vector<64x128xf32>
      %19 = arith.mulf %15, %18 : vector<64x128xf32>
      %20 = arith.select %17, %15, %19 : vector<64x128xi1>, vector<64x128xf32>
      %21 = arith.truncf %20 : vector<64x128xf32> to vector<64x128xbf16>
      %c0_16 = arith.constant 0 : index
      %c0_17 = arith.constant 0 : index
      %22 = vector.load %arg6[%c0_16, %c0_17] : memref<64x128xbf16, #tpu.memory_space<vmem>>, vector<64x128xbf16>
      tpu.vector_store %arg6[%c0_16, %c0_17], %21 {strides = array<i32>} : memref<64x128xbf16, #tpu.memory_space<vmem>>, vector<64x128xbf16>,
    } else {
    }
    return
  }
  func.func @transform_0(%arg0: i32, %arg1: i32, %arg2: i32) -> (i32, i32) {
    %c0_i32 = arith.constant 0 : i32
    return %arg0, %arg2 : i32, i32
  }
  func.func @transform_1(%arg0: i32, %arg1: i32, %arg2: i32) -> (i32, i32) {
    %c0_i32 = arith.constant 0 : i32
    return %arg2, %arg1 : i32, i32
  }
  func.func @transform_2(%arg0: i32, %arg1: i32, %arg2: i32) -> (i32, i32) {
    %c0_i32 = arith.constant 0 : i32
    %c0_i32_0 = arith.constant 0 : i32
    return %c0_i32, %arg1 : i32, i32
  }
  func.func @transform_3(%arg0: i32, %arg1: i32, %arg2: i32) -> (i32, i32) {
    %c0_i32 = arith.constant 0 : i32
    return %arg0, %arg1 : i32, i32
  }
}

module attributes {stable_mosaic.version = 11 : i64} {
  func.func @_matmul_bias_act_kernel(%arg0: i32, %arg1: i32, %arg2: i32, %arg3: memref<64x48xbf16, #tpu.memory_space<vmem>>, %arg4: memref<48x128xbf16, #tpu.memory_space<vmem>>, %arg5: memref<1x128xf32, #tpu.memory_space<vmem>>, %arg6: memref<64x128xf32, #tpu.memory_space<vmem>>, %arg7: memref<64x128xf32, #tpu.memory_space<vmem>>) attributes {dimension_semantics = [#tpu.dimension_semantics<parallel>, #tpu.dimension_semantics<parallel>, #tpu.dimension_semantics<arbitrary>], iteration_bounds = array<i64: 1, 1, 1>, scalar_prefetch = 0 : i64, scratch_operands = 1 : i64, tpu.core_type = #tpu.core_type<tc>, window_params = [{transform_indices = @transform_0, window_bounds = array<i64: 64, 48>}, {transform_indices = @transform_1, window_bounds = array<i64: 48, 128>}, {transform_indices = @transform_2, window_bounds = array<i64: 1, 128>}, {transform_indices = @transform_3, window_bounds = array<i64: 64, 128>}]} {
    %c0_i32 = arith.constant 0 : i32
    %0 = arith.cmpi eq, %arg2, %c0_i32 : i32
    %1 = arith.extui %0 : i1 to i32
    %c0_i32_0 = arith.constant 0 : i32
    %2 = arith.cmpi ne, %1, %c0_i32_0 : i32
    scf.if %2 {
      %cst_10 = arith.constant 0.000000e+00 : f32
      %12 = vector.broadcast %cst_10 : f32 to vector<64x128xf32>
      %c0_11 = arith.constant 0 : index
      %c0_12 = arith.constant 0 : index
      %13 = vector.load %arg7[%c0_11, %c0_12] : memref<64x128xf32, #tpu.memory_space<vmem>>, vector<64x128xf32>
      tpu.vector_store %arg7[%c0_11, %c0_12], %12 {strides = array<i32>} : memref<64x128xf32, #tpu.memory_space<vmem>>, vector<64x128xf32>,
    } else {
    }
    %c0 = arith.constant 0 : index
    %c0_1 = arith.constant 0 : index
    %3 = vector.load %arg7[%c0, %c0_1] : memref<64x128xf32, #tpu.memory_space<vmem>>, vector<64x128xf32>
    %c0_2 = arith.constant 0 : index
    %c0_3 = arith.constant 0 : index
    %4 = vector.load %arg3[%c0_2, %c0_3] : memref<64x48xbf16, #tpu.memory_space<vmem>>, vector<64x48xbf16>
    %c0_4 = arith.constant 0 : index
    %c0_5 = arith.constant 0 : index
    %5 = vector.load %arg4[%c0_4, %c0_5] : memref<48x128xbf16, #tpu.memory_space<vmem>>, vector<48x128xbf16>
    %cst = arith.constant dense<0.000000e+00> : vector<64x128xf32>
    %6 = tpu.matmul %4, %5, %cst {dimension_numbers = #tpu.dot_dimension_numbers<[1], [0], [0], [1], [0, 0, 1, 1], [], []>} : vector<64x48xbf16>, vector<48x128xbf16>, vector<64x128xf32> -> vector<64x128xf32>
    %7 = arith.addf %3, %6 : vector<64x128xf32>
    %c0_6 = arith.constant 0 : index
    %c0_7 = arith.constant 0 : index
    %8 = vector.load %arg7[%c0_6, %c0_7] : memref<64x128xf32, #tpu.memory_space<vmem>>, vector<64x128xf32>
    tpu.vector_store %arg7[%c0_6, %c0_7], %7 {strides = array<i32>} : memref<64x128xf32, #tpu.memory_space<vmem>>, vector<64x128xf32>,
    %c0_i32_8 = arith.constant 0 : i32
    %9 = arith.cmpi eq, %arg2, %c0_i32_8 : i32
    %10 = arith.extui %9 : i1 to i32
    %c0_i32_9 = arith.constant 0 : i32
    %11 = arith.cmpi ne, %10, %c0_i32_9 : i32
    scf.if %11 {
      %c0_10 = arith.constant 0 : index
      %c0_11 = arith.constant 0 : index
      %12 = vector.load %arg7[%c0_10, %c0_11] : memref<64x128xf32, #tpu.memory_space<vmem>>, vector<64x128xf32>
      %c0_12 = arith.constant 0 : index
      %c0_13 = arith.constant 0 : index
      %13 = vector.load %arg5[%c0_12, %c0_13] : memref<1x128xf32, #tpu.memory_space<vmem>>, vector<1x128xf32>
      %14 = vector.broadcast %13 : vector<1x128xf32> to vector<64x128xf32>
      %15 = arith.addf %12, %14 : vector<64x128xf32>
      %c0_14 = arith.constant 0 : index
      %c0_15 = arith.constant 0 : index
      %16 = vector.load %arg6[%c0_14, %c0_15] : memref<64x128xf32, #tpu.memory_space<vmem>>, vector<64x128xf32>
      tpu.vector_store %arg6[%c0_14, %c0_15], %15 {strides = array<i32>} : memref<64x128xf32, #tpu.memory_space<vmem>>, vector<64x128xf32>,
    } else {
    }
    return
  }
  func.func @transform_0(%arg0: i32, %arg1: i32, %arg2: i32) -> (i32, i32) {
    %c0_i32 = arith.constant 0 : i32
    return %arg0, %arg2 : i32, i32
  }
  func.func @transform_1(%arg0: i32, %arg1: i32, %arg2: i32) -> (i32, i32) {
    %c0_i32 = arith.constant 0 : i32
    return %arg2, %arg1 : i32, i32
  }
  func.func @transform_2(%arg0: i32, %arg1: i32, %arg2: i32) -> (i32, i32) {
    %c0_i32 = arith.constant 0 : i32
    %c0_i32_0 = arith.constant 0 : i32
    return %c0_i32, %arg1 : i32, i32
  }
  func.func @transform_3(%arg0: i32, %arg1: i32, %arg2: i32) -> (i32, i32) {
    %c0_i32 = arith.constant 0 : i32
    return %arg0, %arg1 : i32, i32
  }
}

</mosaic_0001>

<bundles_post_ra>
// kernel: forward.21
= control target key start
LH: loop header
LB: loop body
LE: loop exit
PB: predicated region body
PF: predicated region fallthrough
CT: control target
= control target key end

     0   :  { %vm113_vm0 = vcmask 408576   ;;  %vm132_vm1 = vcmask 1040384   ;;  %s661_s0 = inlined_call_operand.vmem [shape: bf16[88,50], index: 0, kind: input, shape index: {}]   ;;  %s662_s1 = inlined_call_operand.vmem [shape: bf16[50,8], index: 1, kind: input, shape index: {}]   ;;  %s663_s2 = inlined_call_operand.vmem [shape: f32[1,8], index: 2, kind: input, shape index: {}]   ;;  %s664_s3 = inlined_call_operand.vmem [shape: bf16[88,8], index: 3, kind: output, shape index: {}]  }
   0x1   :  { %v574_v0 = vld [vmem:[%s662_s1] sm:$0xff]   ;;  %v575_v1 = vld [vmem:[%s662_s1 + $0x8] sm:$0xff]   ;;  %v576_v2 = vld [vmem:[%s662_s1 + $0x10] sm:$0xff]  }
   0x2   :  { %564 = vmatprep.subr.bf16.mxu1 %v574_v0  ;;  %544 = vmatprep.subr.bf16.mxu0 %v574_v0  ;;  %v578_v3 = vld [vmem:[%s661_s0 + $0x10] sm:$0xff]   ;;  %v577_v4 = vld [vmem:[%s662_s1 + $0x18] ss:$0 sps:$4 sm:$0x11]   ;;  %v580_v5 = vld [vmem:[%s661_s0] sm:$0xff]  }
   0x3   :  { %568 = vmatpush3.bf16.msra.mxu1 %v574_v0  ;;  %545 = vmatpush3.bf16.msra.mxu0 %v574_v0  ;;  %v134_v6 = vsel %vm132_vm1, %v577_v4, 0  ;;  %v579_v7 = vld [vmem:[%s661_s0 + $0x18] sm:$0xff]   ;;  %v581_v8 = vld [vmem:[%s661_s0 + $0x8] sm:$0xff]   ;;  %v582_v9 = vld [vmem:[%s661_s0 + $0x20] sm:$0xff]  }
   0x4   :  { %565 = vmatprep.subr.bf16.mxu1 %v575_v1  ;;  %546 = vmatprep.subr.bf16.mxu0 %v575_v1  ;;  %v583_v10 = vld [vmem:[%s661_s0 + $0x28] sm:$0xff]   ;;  %v474_v11 = vld [vmem:[%s663_s2] ss:$0 sm:$0xff] }
   0x5   :  { %556 = vmatprep.mubr.msk.bf16.mxu1 %vm113_vm0, %v578_v3  ;;  %552 = vmatprep.mubr.msk.bf16.mxu0 %vm113_vm0, %v580_v5 }
   0x7   :  { %569 = vmatpush3.bf16.msra.mxu1 %v575_v1  ;;  %547 = vmatpush3.bf16.msra.mxu0 %v575_v1 }
   0x8   :  { %566 = vmatprep.subr.bf16.mxu1 %v576_v2  ;;  %548 = vmatprep.subr.bf16.mxu0 %v576_v2 }
   0xb   :  { %570 = vmatpush3.bf16.msra.mxu1 %v576_v2  ;;  %549 = vmatpush3.bf16.msra.mxu0 %v576_v2 }
   0xc   :  { %573 = vmatprep.subr.msk.bf16.mxu1 %vm132_vm1, %v577_v4  ;;  %572 = vmatprep.subr.msk.bf16.mxu0 %vm132_vm1, %v577_v4 }
   0xf   :  { %571 = vmatpush3.bf16.msra.mxu1 %v134_v6  ;;  %551 = vmatpush3.bf16.msra.mxu0 %v134_v6 }
  0x12   :  { %557 = vmatmul.mubr.msk.bf16.vlgmr.msra.gmra.mrb[0].mxu1 %vm113_vm0, %v579_v7  ;;  %553 = vmatmul.mubr.msk.bf16.vlgmr.msra.gmra.mrb[0].mxu0 %vm113_vm0, %v581_v8 }
  0x13   :  { %560 = vmatprep.mubr.msk.bf16.mxu1 %vm113_vm0, %v582_v9 }
  0x1a   :  { %561 = vmatmul.mubr.msk.bf16.gmra.mrb[4].mxu1 %vm113_vm0, %v583_v10 }
  0xe5   :  { %v558_v12 = vpop.f32.mrb[0].mxu1  ;;  %v554_v13 = vpop.f32.mrb[0].mxu0 }
  0xe6   :  { %v269_v14 = vadd.f32 %v558_v12, %v474_v11  ;;  %v186_v15 = vpop.f32.mrb[1].mxu1  ;;  %v265_v16 = vadd.f32 %v554_v13, %v474_v11  ;;  %v170_v17 = vpop.f32.mrb[1].mxu0 }
  0xe7   :  { %v267_v18 = vadd.f32 %v474_v11, %v186_v15  ;;  %v559_v19 = vpop.f32.mrb[2].mxu1  ;;  %v263_v20 = vadd.f32 %v474_v11, %v170_v17  ;;  %v555_v21 = vpop.f32.mrb[2].mxu0 }
  0xe8   :  { %vm281_vm2 = vcmp.ge.f32.partialorder %v269_v14, 0.0  ;;  %v293_v22 = vmul.f32 0.1, %v269_v14  ;;  %v270_v23 = vadd.f32 %v559_v19, %v474_v11  ;;  %v189_v24 = vpop.f32.mrb[3].mxu1  ;;  %v173_v25 = vpop.f32.mrb[3].mxu0  ;;  %vm277_vm5 = vcmp.ge.f32.partialorder %v265_v16, 0.0 }
  0xe9   :  { %v291_v26 = vmul.f32 0.1, %v267_v18  ;;  %v289_v27 = vmul.f32 0.1, %v265_v16  ;;  %v268_v28 = vadd.f32 %v474_v11, %v189_v24  ;;  %vm279_vm3 = vcmp.ge.f32.partialorder %v267_v18, 0.0 }
  0xea   :  { %vm282_vm4 = vcmp.ge.f32.partialorder %v270_v23, 0.0  ;;  %v294_v29 = vmul.f32 0.1, %v270_v23  ;;  %v305_v30 = vsel %vm281_vm2, %v269_v14, %v293_v22  ;;  %vm275_vm7 = vcmp.ge.f32.partialorder %v263_v20, 0.0 }
  0xeb   :  { %vm280_vm6 = vcmp.ge.f32.partialorder %v268_v28, 0.0  ;;  %v292_v31 = vmul.f32 0.1, %v268_v28  ;;  %v287_v33 = vmul.f32 0.1, %v263_v20  ;;  %v266_v34 = vadd.f32 %v555_v21, %v474_v11 }
  0xec   :  { %v306_v32 = vsel %vm282_vm4, %v270_v23, %v294_v29  ;;  %v264_v35 = vadd.f32 %v474_v11, %v173_v25  ;;  %v303_v36 = vsel %vm279_vm3, %v267_v18, %v291_v26  ;;  %v301_v38 = vsel %vm277_vm5, %v265_v16, %v289_v27 }
  0xed   :  { %v517_v37 = vpack.c.bf16 %v306_v32, %v305_v30  ;;  %v304_v39 = vsel %vm280_vm6, %v268_v28, %v292_v31  ;;  %v562_v40 = vpop.f32.mrb[4].mxu1  ;;  %v299_v42 = vsel %vm275_vm7, %v263_v20, %v287_v33  ;;  %vm278_vm8 = vcmp.ge.f32.partialorder %v266_v34, 0.0 }
  0xee   :  { %v512_v41 = vpack.c.bf16 %v304_v39, %v303_v36  ;;  %v290_v43 = vmul.f32 0.1, %v266_v34  ;;  %v202_v44 = vpop.f32.mrb[5].mxu1  ;;  %vm276_vm9 = vcmp.ge.f32.partialorder %v264_v35, 0.0  ;;  %v288_v45 = vmul.f32 0.1, %v264_v35 }
  0xef   :  { %531 = vst [vmem:[#allocation3 + $0x18] sm:$0xff] %v517_v37   ;;  %v273_v46 = vadd.f32 %v562_v40, %v474_v11  ;;  %v271_v47 = vadd.f32 %v474_v11, %v202_v44  ;;  %v563_v48 = vpop.f32.mrb[6].mxu1 }
  0xf0   :  { %530 = vst [vmem:[#allocation3 + $0x10] sm:$0xff] %v512_v41   ;;  %v302_v49 = vsel %vm278_vm8, %v266_v34, %v290_v43  ;;  %v274_v50 = vadd.f32 %v563_v48, %v474_v11  ;;  %v205_v51 = vpop.f32.mrb[7].mxu1  ;;  %v300_v53 = vsel %vm276_vm9, %v264_v35, %v288_v45 }
  0xf1   :  { %v507_v52 = vpack.c.bf16 %v302_v49, %v301_v38  ;;  %v297_v54 = vmul.f32 0.1, %v273_v46  ;;  %v502_v55 = vpack.c.bf16 %v300_v53, %v299_v42  ;;  %vm285_vm10 = vcmp.ge.f32.partialorder %v273_v46, 0.0 }
  0xf2   :  { %vm286_vm11 = vcmp.ge.f32.partialorder %v274_v50, 0.0  ;;  %v295_v56 = vmul.f32 0.1, %v271_v47  ;;  %v298_v57 = vmul.f32 0.1, %v274_v50  ;;  %v272_v58 = vadd.f32 %v474_v11, %v205_v51 }
  0xf3   :  { %529 = vst [vmem:[#allocation3 + $0x8] sm:$0xff] %v507_v52   ;;  %503 = vst [vmem:[#allocation3] sm:$0xff] %v502_v55   ;;  %vm283_vm12 = vcmp.ge.f32.partialorder %v271_v47, 0.0  ;;  %v309_v59 = vsel %vm285_vm10, %v273_v46, %v297_v54 }
  0xf4   :  { %v310_v60 = vsel %vm286_vm11, %v274_v50, %v298_v57  ;;  %vm284_vm13 = vcmp.ge.f32.partialorder %v272_v58, 0.0  ;;  %v296_v61 = vmul.f32 0.1, %v272_v58  ;;  %v307_v1 = vsel %vm283_vm12, %v271_v47, %v295_v56 }
  0xf5   :  { %v527_v63 = vpack.c.bf16 %v310_v60, %v309_v59 }
  0xf6   :  { %v400_v62 = vld [vmem:[#allocation3 + $0x18] sm:$0xff]   ;;  %v308_v2 = vsel %vm284_vm13, %v272_v58, %v296_v61 }
  0xf7   :  { %401 = vst [vmem:[%s664_s3 + $0x18] sm:$0xff] %v400_v62   ;;  %v396_v0 = vld [vmem:[#allocation3 + $0x10] sm:$0xff]   ;;  %533 = vst [vmem:[#allocation3 + $0x28] sm:$0xff] %v527_v63   ;;  %v522_v3 = vpack.c.bf16 %v308_v2, %v307_v1 }
  0xf8   :  { %397 = vst [vmem:[%s664_s3 + $0x10] sm:$0xff] %v396_v0  }
  0xf9   :  { %532 = vst [vmem:[#allocation3 + $0x20] sm:$0xff] %v522_v3  }
  0xfa   :  { %v392_v4 = vld [vmem:[#allocation3 + $0x8] sm:$0xff]   ;;  %v388_v5 = vld [vmem:[#allocation3] sm:$0xff]  }
  0xfb   :  { %393 = vst [vmem:[%s664_s3 + $0x8] sm:$0xff] %v392_v4   ;;  %389 = vst [vmem:[%s664_s3] sm:$0xff] %v388_v5  }
  0xfe   :  { %v408_v6 = vld [vmem:[#allocation3 + $0x28] sm:$0xf] }
  0xff   :  { %409 = vst [vmem:[%s664_s3 + $0x28] sm:$0xf] %v408_v6 }
 0x100   :  { %v404_v7 = vld [vmem:[#allocation3 + $0x20] sm:$0xff]  }
 0x101   :  { %405 = vst [vmem:[%s664_s3 + $0x20] sm:$0xff] %v404_v7  }

// kernel: forward.23
= control target key start
LH: loop header
LB: loop body
LE: loop exit
PB: predicated region body
PF: predicated region fallthrough
CT: control target
= control target key end

     0   :  { %v151_v0 = vmov 0.0   ;;  %vm152_vm0 = vmmov 0   ;;  %vm56_vm1 = vcmask 392192   ;;  %s194_s1 = inlined_call_operand.vmem [shape: bf16[48,1], index: 1, kind: input, shape index: {}]   ;;  %s195_s2 = inlined_call_operand.<no memory space> [shape: f32[1,1], index: 2, kind: input, shape index: {}]   ;;  %s196_s0 = inlined_call_operand.vmem [shape: bf16[16,48], index: 0, kind: input, shape index: {}]   ;;  %s197_s3 = inlined_call_operand.vmem [shape: f32[16,1], index: 3, kind: output, shape index: {}]  }
   0x1   :  { %135 = vmatprep.subr.bf16.mxu0 %v151_v0  ;;  %v147_v1 = vld [vmem:[%s194_s1] sm:$0xff]   ;;  %141 = vmatprep.mubr.msk.bf16.mxu0 %vm152_vm0, %v151_v0  ;;  %v8_v2 = vstv %s195_s2  ;;  %v148_v3 = vld [vmem:[%s194_s1 + $0x8] sm:$0xff]   ;;  %v149_v4 = vld [vmem:[%s194_s1 + $0x10] sm:$0xff]  }
   0x2   :  { %9 = vst [vmem:[#allocation3] sm:$0x1] %v8_v2  ;;  %136 = vmatpush3.bf16.msra.mxu0 %v147_v1  ;;  %v150_v5 = vld [vmem:[%s196_s0] sm:$0xff]  }
   0x3   :  { %137 = vmatprep.subr.bf16.mxu0 %v151_v0 }
   0x6   :  { %138 = vmatpush3.bf16.msra.mxu0 %v148_v3 }
   0x7   :  { %139 = vmatprep.subr.bf16.mxu0 %v151_v0 }
   0x9   :  { %v130_v6 = vld [vmem:[#allocation3] ss:$0 sm:$0xff] }
   0xa   :  { %140 = vmatpush3.bf16.msra.mxu0 %v149_v4 }
   0xd   :  { %142 = vmatmul.mubr.msk.bf16.vlgmr.msra.gmra.mrb[0].mxu0 %vm56_vm1, %v150_v5 }
  0xe0   :  { %v94_v7 = vpop.f32.mrb[0].mxu0 }
  0xe1   :  { %v117_v8 = vadd.f32 %v130_v6, %v94_v7  ;;  %v143_v9 = vpop.f32.mrb[1].mxu0 }
  0xe2   :  { %v97_v10 = vpop.f32.mrb[2].mxu0 }
  0xe3   :  { %119 = vst [vmem:[%s197_s3] sm:$0xff] %v117_v8  ;;  %v118_v11 = vadd.f32 %v130_v6, %v97_v10  ;;  %v144_v12 = vpop.f32.mrb[3].mxu0 }
  0xe5   :  { %120 = vst [vmem:[%s197_s3 + $0x8] sm:$0xff] %v118_v11 }

// kernel: forward.22
= control target key start
LH: loop header
LB: loop body
LE: loop exit
PB: predicated region body
PF: predicated region fallthrough
CT: control target
= control target key end

     0   :  { %v264_v0 = vmov 0   ;;  %vm134_vm0 = vcmask 588800   ;;  %vm138_vm1 = vcmask 1043456   ;;  %s336_s1 = inlined_call_operand.vmem [shape: bf16[200,16], index: 1, kind: input, shape index: {}]   ;;  %s337_s0 = inlined_call_operand.vmem [shape: bf16[16,200], index: 0, kind: input, shape index: {}]   ;;  %s338_s2 = inlined_call_operand.vmem [shape: f32[1,16], index: 2, kind: input, shape index: {}]   ;;  %s339_s3 = inlined_call_operand.vmem [shape: bf16[16,16], index: 3, kind: output, shape index: {}]  }
   0x1   :  { %142 = vmatprep.subr.bf16.mxu0 %v264_v0  ;;  %v248_v1 = vld [vmem:[%s336_s1] sm:$0xff]   ;;  %v249_v2 = vld [vmem:[%s336_s1 + $0x8] sm:$0xff]   ;;  %v250_v3 = vld [vmem:[%s336_s1 + $0x10] sm:$0xff]  }
   0x2   :  { %143 = vmatpush1.bf16.msra.mxu0 %v248_v1  ;;  %v251_v4 = vld [vmem:[%s336_s1 + $0x18] sm:$0xff]   ;;  %v263_v5 = vld [vmem:[%s337_s0 + $0x4] ss:$8 sps:$4 sm:$0xff]   ;;  %v254_v8 = vld [vmem:[%s336_s1 + $0x30] sm:$0xff]  }
   0x3   :  { %144 = vmatprep.subr.bf16.mxu0 %v264_v0  ;;  %v252_v6 = vld [vmem:[%s336_s1 + $0x20] sm:$0xff]   ;;  %236 = vmatprep.mubr.msk.bf16.mxu0 %vm134_vm0, %v263_v5  ;;  %v253_v7 = vld [vmem:[%s336_s1 + $0x28] sm:$0xff]   ;;  %v255_v9 = vld [vmem:[%s336_s1 + $0x38] sm:$0xff]  }
   0x4   :  { %v256_v10 = vld [vmem:[%s336_s1 + $0x40] sm:$0xff]   ;;  %v257_v11 = vld [vmem:[%s336_s1 + $0x48] sm:$0xff]   ;;  %v258_v12 = vld [vmem:[%s336_s1 + $0x50] sm:$0xff]  }
   0x5   :  { %v259_v13 = vld [vmem:[%s336_s1 + $0x58] sm:$0xff]   ;;  %v260_v14 = vld [vmem:[%s336_s1 + $0x60] ss:$0 sps:$4 sm:$0xff]  }
   0x6   :  { %145 = vmatpush1.bf16.msra.mxu0 %v249_v2  ;;  %v140_v15 = vsel %vm138_vm1, %v260_v14, 0  ;;  %v261_v16 = vld [vmem:[%s337_s0] ss:$8 sps:$4 sm:$0xff]  }
   0x7   :  { %146 = vmatprep.subr.bf16.mxu0 %v264_v0  ;;  %v237_v17 = vld [vmem:[%s338_s2] ss:$0 sm:$0xff] }
   0xa   :  { %147 = vmatpush1.bf16.msra.mxu0 %v250_v3 }
   0xb   :  { %148 = vmatprep.subr.bf16.mxu0 %v264_v0 }
   0xe   :  { %149 = vmatpush1.bf16.msra.mxu0 %v251_v4 }
   0xf   :  { %150 = vmatprep.subr.bf16.mxu0 %v264_v0 }
  0x12   :  { %151 = vmatpush1.bf16.msra.mxu0 %v252_v6 }
  0x13   :  { %152 = vmatprep.subr.bf16.mxu0 %v264_v0 }
  0x16   :  { %153 = vmatpush1.bf16.msra.mxu0 %v253_v7 }
  0x17   :  { %154 = vmatprep.subr.bf16.mxu0 %v264_v0 }
  0x1a   :  { %155 = vmatpush1.bf16.msra.mxu0 %v254_v8 }
  0x1b   :  { %156 = vmatprep.subr.bf16.mxu0 %v264_v0 }
  0x1e   :  { %157 = vmatpush1.bf16.msra.mxu0 %v255_v9 }
  0x1f   :  { %158 = vmatprep.subr.bf16.mxu0 %v264_v0 }
  0x22   :  { %159 = vmatpush1.bf16.msra.mxu0 %v256_v10 }
  0x23   :  { %160 = vmatprep.subr.bf16.mxu0 %v264_v0 }
  0x26   :  { %161 = vmatpush1.bf16.msra.mxu0 %v257_v11 }
  0x27   :  { %162 = vmatprep.subr.bf16.mxu0 %v264_v0 }
  0x2a   :  { %163 = vmatpush1.bf16.msra.mxu0 %v258_v12 }
  0x2b   :  { %164 = vmatprep.subr.bf16.mxu0 %v264_v0 }
  0x2e   :  { %165 = vmatpush1.bf16.msra.mxu0 %v259_v13 }
  0x2f   :  { %166 = vmatprep.subr.bf16.mxu0 %v264_v0 }
  0x32   :  { %167 = vmatpush1.bf16.msra.mxu0 %v140_v15 }
  0x35   :  { %175 = vmatmul.mubr.bf16.vlgmr.msra.gmra.mrb[0].mxu0 %v261_v16 }
 0x108   :  { %v176_v18 = vpop.f32.mrb[0].mxu0 }
 0x109   :  { %v199_v19 = vadd.f32 %v237_v17, %v176_v18  ;;  %v178_v20 = vpop.f32.mrb[1].mxu0 }
 0x10a   :  { %v179_v21 = vpop.f32.mrb[2].mxu0 }
 0x10b   :  { %v203_v22 = vmul.f32 0.1, %v199_v19  ;;  %v200_v23 = vadd.f32 %v237_v17, %v179_v21  ;;  %v181_v24 = vpop.f32.mrb[3].mxu0  ;;  %vm201_vm2 = vcmp.ge.f32.partialorder %v199_v19, 0.0 }
 0x10d   :  { %vm202_vm3 = vcmp.ge.f32.partialorder %v200_v23, 0.0  ;;  %v204_v25 = vmul.f32 0.1, %v200_v23  ;;  %v205_v26 = vsel %vm201_vm2, %v199_v19, %v203_v22 }
 0x10f   :  { %v206_v27 = vsel %vm202_vm3, %v200_v23, %v204_v25 }
 0x110   :  { %v245_v28 = vpack.c.bf16 %v206_v27, %v205_v26 }
 0x112   :  { %246 = vst [vmem:[%s339_s3] sm:$0xff] %v245_v28  }

// kernel: forward.15
= control target key start
LH: loop header
LB: loop body
LE: loop exit
PB: predicated region body
PF: predicated region fallthrough
CT: control target
= control target key end

     0   :  { %vm175_vm0 = vcmask 1041408   ;;  %vm176_vm1 = vcmask 1042432   ;;  %v910_v1 = vmov 0.0   ;;  %v911_v2 = vmov 65535   ;;  %s1051_s0 = inlined_call_operand.vmem [shape: bf16[168,5], index: 0, kind: input, shape index: {}]   ;;  %s1052_s1 = inlined_call_operand.vmem [shape: bf16[5,8], index: 1, kind: input, shape index: {}]   ;;  %s1053_s2 = inlined_call_operand.vmem [shape: f32[1,8], index: 2, kind: input, shape index: {}]   ;;  %s1054_s3 = inlined_call_operand.vmem [shape: bf16[168,8], index: 3, kind: output, shape index: {}]  }
   0x1   :  { %v85_v0 = vld [vmem:[%s1052_s1] sm:$0x7]  ;;  %848 = vmatprep.subr.bf16.mxu0 %v910_v1  ;;  %v177_v3 = vsel %vm175_vm0, 4294967295, %v911_v2  ;;  %894 = vmatprep.subr.bf16.mxu1 %v910_v1  ;;  %vm912_vm2 = vmmov 0   ;;  %v900_v7 = vld [vmem:[%s1051_s0 + $0x30] sm:$0xff]   ;;  %vm141_vm3 = vcmask 39936  }
   0x2   :  { %v178_v4 = vsel %vm176_vm1, %v177_v3, 0  ;;  %850 = vmatprep.mubr.msk.bf16.mxu0 %vm912_vm2, %v910_v1  ;;  %v899_v5 = vld [vmem:[%s1051_s0] sm:$0xff]   ;;  %874 = vmatprep.mubr.msk.bf16.mxu1 %vm912_vm2, %v910_v1  ;;  %v901_v8 = vld [vmem:[%s1051_s0 + $0x8] sm:$0xff]   ;;  %v902_v9 = vld [vmem:[%s1051_s0 + $0x38] sm:$0xff]  }
   0x3   :  { %v180_v6 = vand.u32 %v178_v4, %v85_v0  ;;  %v903_v10 = vld [vmem:[%s1051_s0 + $0x10] sm:$0xff]   ;;  %v904_v11 = vld [vmem:[%s1051_s0 + $0x40] sm:$0xff]   ;;  %v905_v12 = vld [vmem:[%s1051_s0 + $0x18] sm:$0xff]  }
   0x4   :  { %v906_v13 = vld [vmem:[%s1051_s0 + $0x48] sm:$0xff]   ;;  %v907_v14 = vld [vmem:[%s1051_s0 + $0x20] sm:$0xff]   ;;  %v908_v15 = vld [vmem:[%s1051_s0 + $0x50] sm:$0xff]  }
   0x5   :  { %849 = vmatpush3.bf16.msra.mxu0 %v180_v6  ;;  %895 = vmatpush3.bf16.msra.mxu1 %v180_v6  ;;  %v909_v16 = vld [vmem:[%s1051_s0 + $0x28] sm:$0xff]   ;;  %v994_v17 = vld [vmem:[%s1053_s2] ss:$0 sm:$0xff] }
   0x8   :  { %851 = vmatmul.mubr.msk.bf16.vlgmr.msra.gmra.mrb[0].mxu0 %vm141_vm3, %v899_v5  ;;  %875 = vmatmul.mubr.msk.bf16.vlgmr.msra.gmra.mrb[0].mxu1 %vm141_vm3, %v900_v7 }
   0x9   :  { %854 = vmatprep.mubr.msk.bf16.mxu0 %vm912_vm2, %v910_v1  ;;  %878 = vmatprep.mubr.msk.bf16.mxu1 %vm912_vm2, %v910_v1 }
  0x10   :  { %855 = vmatmul.mubr.msk.bf16.gmra.mrb[4].mxu0 %vm141_vm3, %v901_v8  ;;  %879 = vmatmul.mubr.msk.bf16.gmra.mrb[4].mxu1 %vm141_vm3, %v902_v9 }
  0x11   :  { %858 = vmatprep.mubr.msk.bf16.mxu0 %vm912_vm2, %v910_v1  ;;  %882 = vmatprep.mubr.msk.bf16.mxu1 %vm912_vm2, %v910_v1 }
  0x18   :  { %859 = vmatmul.mubr.msk.bf16.gmra.mrb[8].mxu0 %vm141_vm3, %v903_v10  ;;  %883 = vmatmul.mubr.msk.bf16.gmra.mrb[8].mxu1 %vm141_vm3, %v904_v11 }
  0x19   :  { %862 = vmatprep.mubr.msk.bf16.mxu0 %vm912_vm2, %v910_v1  ;;  %886 = vmatprep.mubr.msk.bf16.mxu1 %vm912_vm2, %v910_v1 }
  0x20   :  { %863 = vmatmul.mubr.msk.bf16.gmra.mrb[12].mxu0 %vm141_vm3, %v905_v12  ;;  %887 = vmatmul.mubr.msk.bf16.gmra.mrb[12].mxu1 %vm141_vm3, %v906_v13 }
  0x21   :  { %866 = vmatprep.mubr.msk.bf16.mxu0 %vm912_vm2, %v910_v1  ;;  %890 = vmatprep.mubr.msk.bf16.mxu1 %vm912_vm2, %v910_v1 }
  0x28   :  { %867 = vmatmul.mubr.msk.bf16.gmra.mrb[16].mxu0 %vm141_vm3, %v907_v14  ;;  %891 = vmatmul.mubr.msk.bf16.gmra.mrb[16].mxu1 %vm141_vm3, %v908_v15 }
  0x29   :  { %870 = vmatprep.mubr.msk.bf16.mxu0 %vm912_vm2, %v910_v1 }
  0x30   :  { %871 = vmatmul.mubr.msk.bf16.gmra.mrb[20].mxu0 %vm141_vm3, %v909_v16 }
  0xdb   :  { %v216_v18 = vpop.f32.mrb[0].mxu0  ;;  %v264_v19 = vpop.f32.mrb[0].mxu1 }
  0xdc   :  { %v379_v20 = vadd.f32 %v994_v17, %v216_v18  ;;  %v852_v21 = vpop.f32.mrb[1].mxu0  ;;  %v391_v22 = vadd.f32 %v994_v17, %v264_v19  ;;  %v876_v23 = vpop.f32.mrb[1].mxu1 }
  0xdd   :  { %v219_v24 = vpop.f32.mrb[2].mxu0  ;;  %v267_v25 = vpop.f32.mrb[2].mxu1 }
  0xde   :  { %v423_v26 = vmul.f32 0.1, %v379_v20  ;;  %v380_v27 = vadd.f32 %v994_v17, %v219_v24  ;;  %v853_v28 = vpop.f32.mrb[3].mxu0  ;;  %vm413_vm4 = vcmp.ge.f32.partialorder %v391_v22, 0.0  ;;  %v877_v29 = vpop.f32.mrb[3].mxu1  ;;  %vm401_vm5 = vcmp.ge.f32.partialorder %v379_v20, 0.0 }
  0xdf   :  { %v435_v30 = vmul.f32 0.1, %v391_v22  ;;  %v392_v31 = vadd.f32 %v994_v17, %v267_v25 }
  0xe0   :  { %vm402_vm6 = vcmp.ge.f32.partialorder %v380_v27, 0.0  ;;  %v424_v32 = vmul.f32 0.1, %v380_v27  ;;  %v445_v35 = vsel %vm401_vm5, %v379_v20, %v423_v26 }
  0xe1   :  { %v457_v33 = vsel %vm413_vm4, %v391_v22, %v435_v30  ;;  %vm414_vm7 = vcmp.ge.f32.partialorder %v392_v31, 0.0  ;;  %v436_v34 = vmul.f32 0.1, %v392_v31 }
  0xe2   :  { %v446_v36 = vsel %vm402_vm6, %v380_v27, %v424_v32 }
  0xe3   :  { %v774_v37 = vpack.c.bf16 %v446_v36, %v445_v35  ;;  %v458_v38 = vsel %vm414_vm7, %v392_v31, %v436_v34  ;;  %v224_v39 = vpop.f32.mrb[4].mxu0  ;;  %v272_v40 = vpop.f32.mrb[4].mxu1 }
  0xe4   :  { %v804_v41 = vpack.c.bf16 %v458_v38, %v457_v33  ;;  %v381_v42 = vadd.f32 %v994_v17, %v224_v39  ;;  %v856_v43 = vpop.f32.mrb[5].mxu0  ;;  %v393_v44 = vadd.f32 %v994_v17, %v272_v40  ;;  %v880_v45 = vpop.f32.mrb[5].mxu1 }
  0xe5   :  { %775 = vst [vmem:[#allocation3] sm:$0xff] %v774_v37   ;;  %v227_v46 = vpop.f32.mrb[6].mxu0  ;;  %v275_v47 = vpop.f32.mrb[6].mxu1 }
  0xe6   :  { %831 = vst [vmem:[#allocation3 + $0x30] sm:$0xff] %v804_v41   ;;  %v425_v48 = vmul.f32 0.1, %v381_v42  ;;  %v382_v49 = vadd.f32 %v994_v17, %v227_v46  ;;  %v857_v50 = vpop.f32.mrb[7].mxu0  ;;  %vm415_vm8 = vcmp.ge.f32.partialorder %v393_v44, 0.0  ;;  %v881_v51 = vpop.f32.mrb[7].mxu1  ;;  %v394_v53 = vadd.f32 %v994_v17, %v275_v47 }
  0xe7   :  { %vm403_vm9 = vcmp.ge.f32.partialorder %v381_v42, 0.0  ;;  %v437_v52 = vmul.f32 0.1, %v393_v44 }
  0xe8   :  { %vm404_vm10 = vcmp.ge.f32.partialorder %v382_v49, 0.0  ;;  %v426_v54 = vmul.f32 0.1, %v382_v49  ;;  %vm416_vm11 = vcmp.ge.f32.partialorder %v394_v53, 0.0  ;;  %v438_v56 = vmul.f32 0.1, %v394_v53 }
  0xe9   :  { %v459_v55 = vsel %vm415_vm8, %v393_v44, %v437_v52  ;;  %v447_v57 = vsel %vm403_vm9, %v381_v42, %v425_v48 }
  0xea   :  { %v448_v58 = vsel %vm404_vm10, %v382_v49, %v426_v54  ;;  %v460_v60 = vsel %vm416_vm11, %v394_v53, %v438_v56 }
  0xeb   :  { %v779_v59 = vpack.c.bf16 %v448_v58, %v447_v57  ;;  %v232_v61 = vpop.f32.mrb[8].mxu0  ;;  %v280_v62 = vpop.f32.mrb[8].mxu1  ;;  %v809_v0 = vpack.c.bf16 %v460_v60, %v459_v55 }
  0xec   :  { %v594_v63 = vld [vmem:[#allocation3] sm:$0xff]   ;;  %v383_v1 = vadd.f32 %v994_v17, %v232_v61  ;;  %v860_v2 = vpop.f32.mrb[9].mxu0  ;;  %v395_v3 = vadd.f32 %v994_v17, %v280_v62  ;;  %v884_v4 = vpop.f32.mrb[9].mxu1 }
  0xed   :  { %595 = vst [vmem:[%s1054_s3] sm:$0xff] %v594_v63   ;;  %v618_v5 = vld [vmem:[#allocation3 + $0x30] sm:$0xff]   ;;  %826 = vst [vmem:[#allocation3 + $0x8] sm:$0xff] %v779_v59   ;;  %v235_v6 = vpop.f32.mrb[10].mxu0  ;;  %v283_v7 = vpop.f32.mrb[10].mxu1 }
  0xee   :  { %619 = vst [vmem:[%s1054_s3 + $0x30] sm:$0xff] %v618_v5   ;;  %832 = vst [vmem:[#allocation3 + $0x38] sm:$0xff] %v809_v0   ;;  %v427_v8 = vmul.f32 0.1, %v383_v1  ;;  %v384_v9 = vadd.f32 %v994_v17, %v235_v6  ;;  %v861_v10 = vpop.f32.mrb[11].mxu0  ;;  %vm417_vm12 = vcmp.ge.f32.partialorder %v395_v3, 0.0  ;;  %v396_v13 = vadd.f32 %v994_v17, %v283_v7 }
  0xef   :  { %v885_v11 = vpop.f32.mrb[11].mxu1  ;;  %vm405_vm13 = vcmp.ge.f32.partialorder %v383_v1, 0.0  ;;  %v439_v12 = vmul.f32 0.1, %v395_v3 }
  0xf0   :  { %vm406_vm14 = vcmp.ge.f32.partialorder %v384_v9, 0.0  ;;  %v428_v14 = vmul.f32 0.1, %v384_v9  ;;  %vm418_vm15 = vcmp.ge.f32.partialorder %v396_v13, 0.0  ;;  %v440_v16 = vmul.f32 0.1, %v396_v13 }
  0xf1   :  { %v461_v15 = vsel %vm417_vm12, %v395_v3, %v439_v12  ;;  %v449_v18 = vsel %vm405_vm13, %v383_v1, %v427_v8 }
  0xf2   :  { %v450_v19 = vsel %vm406_vm14, %v384_v9, %v428_v14  ;;  %v462_v21 = vsel %vm418_vm15, %v396_v13, %v440_v16 }
  0xf3   :  { %v784_v20 = vpack.c.bf16 %v450_v19, %v449_v18  ;;  %v240_v22 = vpop.f32.mrb[12].mxu0  ;;  %v288_v23 = vpop.f32.mrb[12].mxu1  ;;  %v814_v25 = vpack.c.bf16 %v462_v21, %v461_v15 }
  0xf4   :  { %v598_v24 = vld [vmem:[#allocation3 + $0x8] sm:$0xff]   ;;  %v385_v26 = vadd.f32 %v994_v17, %v240_v22  ;;  %v864_v27 = vpop.f32.mrb[13].mxu0  ;;  %v397_v28 = vadd.f32 %v994_v17, %v288_v23  ;;  %v888_v29 = vpop.f32.mrb[13].mxu1 }
  0xf5   :  { %599 = vst [vmem:[%s1054_s3 + $0x8] sm:$0xff] %v598_v24   ;;  %v622_v30 = vld [vmem:[#allocation3 + $0x38] sm:$0xff]   ;;  %827 = vst [vmem:[#allocation3 + $0x10] sm:$0xff] %v784_v20   ;;  %v243_v31 = vpop.f32.mrb[14].mxu0  ;;  %v291_v32 = vpop.f32.mrb[14].mxu1 }
  0xf6   :  { %623 = vst [vmem:[%s1054_s3 + $0x38] sm:$0xff] %v622_v30   ;;  %833 = vst [vmem:[#allocation3 + $0x40] sm:$0xff] %v814_v25   ;;  %v429_v33 = vmul.f32 0.1, %v385_v26  ;;  %v386_v34 = vadd.f32 %v994_v17, %v243_v31  ;;  %v865_v35 = vpop.f32.mrb[15].mxu0  ;;  %vm419_vm0 = vcmp.ge.f32.partialorder %v397_v28, 0.0  ;;  %v398_v38 = vadd.f32 %v994_v17, %v291_v32 }
  0xf7   :  { %v889_v36 = vpop.f32.mrb[15].mxu1  ;;  %vm407_vm1 = vcmp.ge.f32.partialorder %v385_v26, 0.0  ;;  %v441_v37 = vmul.f32 0.1, %v397_v28 }
  0xf8   :  { %vm408_vm2 = vcmp.ge.f32.partialorder %v386_v34, 0.0  ;;  %v430_v39 = vmul.f32 0.1, %v386_v34  ;;  %vm420_vm3 = vcmp.ge.f32.partialorder %v398_v38, 0.0  ;;  %v442_v41 = vmul.f32 0.1, %v398_v38 }
  0xf9   :  { %v463_v40 = vsel %vm419_vm0, %v397_v28, %v441_v37  ;;  %v451_v42 = vsel %vm407_vm1, %v385_v26, %v429_v33 }
  0xfa   :  { %v452_v43 = vsel %vm408_vm2, %v386_v34, %v430_v39  ;;  %v464_v45 = vsel %vm420_vm3, %v398_v38, %v442_v41 }
  0xfb   :  { %v789_v44 = vpack.c.bf16 %v452_v43, %v451_v42  ;;  %v248_v46 = vpop.f32.mrb[16].mxu0  ;;  %v296_v47 = vpop.f32.mrb[16].mxu1  ;;  %v819_v49 = vpack.c.bf16 %v464_v45, %v463_v40 }
  0xfc   :  { %v602_v48 = vld [vmem:[#allocation3 + $0x10] sm:$0xff]   ;;  %v387_v50 = vadd.f32 %v994_v17, %v248_v46  ;;  %v868_v51 = vpop.f32.mrb[17].mxu0  ;;  %v399_v52 = vadd.f32 %v994_v17, %v296_v47  ;;  %v892_v53 = vpop.f32.mrb[17].mxu1 }
  0xfd   :  { %603 = vst [vmem:[%s1054_s3 + $0x10] sm:$0xff] %v602_v48   ;;  %v626_v54 = vld [vmem:[#allocation3 + $0x40] sm:$0xff]   ;;  %828 = vst [vmem:[#allocation3 + $0x18] sm:$0xff] %v789_v44   ;;  %v251_v55 = vpop.f32.mrb[18].mxu0  ;;  %v299_v56 = vpop.f32.mrb[18].mxu1 }
  0xfe   :  { %627 = vst [vmem:[%s1054_s3 + $0x40] sm:$0xff] %v626_v54   ;;  %834 = vst [vmem:[#allocation3 + $0x48] sm:$0xff] %v819_v49   ;;  %v431_v57 = vmul.f32 0.1, %v387_v50  ;;  %v388_v58 = vadd.f32 %v994_v17, %v251_v55  ;;  %v869_v59 = vpop.f32.mrb[19].mxu0  ;;  %vm421_vm4 = vcmp.ge.f32.partialorder %v399_v52, 0.0  ;;  %v400_v62 = vadd.f32 %v994_v17, %v299_v56 }
  0xff   :  { %v893_v60 = vpop.f32.mrb[19].mxu1  ;;  %vm409_vm5 = vcmp.ge.f32.partialorder %v387_v50, 0.0  ;;  %v443_v61 = vmul.f32 0.1, %v399_v52 }
 0x100   :  { %vm410_vm6 = vcmp.ge.f32.partialorder %v388_v58, 0.0  ;;  %v432_v63 = vmul.f32 0.1, %v388_v58  ;;  %vm422_vm7 = vcmp.ge.f32.partialorder %v400_v62, 0.0  ;;  %v444_v1 = vmul.f32 0.1, %v400_v62 }
 0x101   :  { %v465_v0 = vsel %vm421_vm4, %v399_v52, %v443_v61  ;;  %v453_v2 = vsel %vm409_vm5, %v387_v50, %v431_v57 }
 0x102   :  { %v454_v3 = vsel %vm410_vm6, %v388_v58, %v432_v63  ;;  %v466_v5 = vsel %vm422_vm7, %v400_v62, %v444_v1 }
 0x103   :  { %v794_v4 = vpack.c.bf16 %v454_v3, %v453_v2  ;;  %v256_v6 = vpop.f32.mrb[20].mxu0  ;;  %v824_v8 = vpack.c.bf16 %v466_v5, %v465_v0 }
 0x104   :  { %v606_v7 = vld [vmem:[#allocation3 + $0x18] sm:$0xff]   ;;  %v389_v9 = vadd.f32 %v994_v17, %v256_v6  ;;  %v872_v10 = vpop.f32.mrb[21].mxu0 }
 0x105   :  { %607 = vst [vmem:[%s1054_s3 + $0x18] sm:$0xff] %v606_v7   ;;  %v630_v11 = vld [vmem:[#allocation3 + $0x48] sm:$0xff]   ;;  %829 = vst [vmem:[#allocation3 + $0x20] sm:$0xff] %v794_v4   ;;  %v259_v12 = vpop.f32.mrb[22].mxu0 }
 0x106   :  { %631 = vst [vmem:[%s1054_s3 + $0x48] sm:$0xff] %v630_v11   ;;  %835 = vst [vmem:[#allocation3 + $0x50] sm:$0xff] %v824_v8   ;;  %v433_v13 = vmul.f32 0.1, %v389_v9  ;;  %v390_v14 = vadd.f32 %v994_v17, %v259_v12  ;;  %v873_v15 = vpop.f32.mrb[23].mxu0  ;;  %vm411_vm8 = vcmp.ge.f32.partialorder %v389_v9, 0.0 }
 0x108   :  { %vm412_vm9 = vcmp.ge.f32.partialorder %v390_v14, 0.0  ;;  %v434_v16 = vmul.f32 0.1, %v390_v14  ;;  %v455_v18 = vsel %vm411_vm8, %v389_v9, %v433_v13 }
 0x10a   :  { %v456_v19 = vsel %vm412_vm9, %v390_v14, %v434_v16 }
 0x10b   :  { %v799_v20 = vpack.c.bf16 %v456_v19, %v455_v18 }
 0x10c   :  { %v610_v21 = vld [vmem:[#allocation3 + $0x20] sm:$0xff]  }
 0x10d   :  { %611 = vst [vmem:[%s1054_s3 + $0x20] sm:$0xff] %v610_v21   ;;  %v634_v22 = vld [vmem:[#allocation3 + $0x50] sm:$0xf]  ;;  %830 = vst [vmem:[#allocation3 + $0x28] sm:$0xff] %v799_v20  }
 0x10e   :  { %635 = vst [vmem:[%s1054_s3 + $0x50] sm:$0xf] %v634_v22 }
 0x114   :  { %v614_v23 = vld [vmem:[#allocation3 + $0x28] sm:$0xff]  }
 0x115   :  { %615 = vst [vmem:[%s1054_s3 + $0x28] sm:$0xff] %v614_v23  }

// kernel: forward.16
= control target key start
LH: loop header
LB: loop body
LE: loop exit
PB: predicated region body
PF: predicated region fallthrough
CT: control target
= control target key end

     0   :  { %vm83_vm0 = vcmask 326656   ;;  %vm96_vm1 = vcmask 1043456   ;;  %s424_s1 = inlined_call_operand.vmem [shape: bf16[40,16], index: 1, kind: input, shape index: {}]   ;;  %s425_s0 = inlined_call_operand.vmem [shape: bf16[60,40], index: 0, kind: input, shape index: {}]   ;;  %s426_s2 = inlined_call_operand.vmem [shape: f32[1,16], index: 2, kind: input, shape index: {}]   ;;  %s427_s3 = inlined_call_operand.vmem [shape: bf16[60,16], index: 3, kind: output, shape index: {}]  }
   0x1   :  { %v355_v0 = vld [vmem:[%s424_s1] sm:$0xff]   ;;  %v356_v1 = vld [vmem:[%s424_s1 + $0x8] sm:$0xff]   ;;  %v357_v2 = vld [vmem:[%s424_s1 + $0x10] ss:$0 sps:$4 sm:$0xff]  }
   0x2   :  { %333 = vmatprep.subr.bf16.mxu0 %v355_v0  ;;  %347 = vmatprep.subr.bf16.mxu1 %v355_v0  ;;  %v358_v3 = vld [vmem:[%s425_s0] sm:$0xff]   ;;  %v359_v4 = vld [vmem:[%s425_s0 + $0x10] sm:$0xff]   ;;  %v98_v5 = vsel %vm96_vm1, %v357_v2, 0  ;;  %v360_v6 = vld [vmem:[%s425_s0 + $0x8] sm:$0xff]  }
   0x3   :  { %334 = vmatpush3.bf16.msra.mxu0 %v355_v0  ;;  %350 = vmatpush3.bf16.msra.mxu1 %v355_v0  ;;  %v361_v7 = vld [vmem:[%s425_s0 + $0x18] sm:$0xff]   ;;  %v286_v8 = vld [vmem:[%s426_s2] ss:$0 sm:$0xff] }
   0x4   :  { %335 = vmatprep.subr.bf16.mxu0 %v356_v1  ;;  %348 = vmatprep.subr.bf16.mxu1 %v356_v1 }
   0x5   :  { %339 = vmatprep.mubr.msk.bf16.mxu0 %vm83_vm0, %v358_v3  ;;  %343 = vmatprep.mubr.msk.bf16.mxu1 %vm83_vm0, %v359_v4 }
   0x7   :  { %336 = vmatpush3.bf16.msra.mxu0 %v356_v1  ;;  %351 = vmatpush3.bf16.msra.mxu1 %v356_v1 }
   0x8   :  { %353 = vmatprep.subr.msk.bf16.mxu0 %vm96_vm1, %v357_v2  ;;  %354 = vmatprep.subr.msk.bf16.mxu1 %vm96_vm1, %v357_v2 }
   0xb   :  { %338 = vmatpush3.bf16.msra.mxu0 %v98_v5  ;;  %352 = vmatpush3.bf16.msra.mxu1 %v98_v5 }
   0xe   :  { %340 = vmatmul.mubr.msk.bf16.vlgmr.msra.gmra.mrb[0].mxu0 %vm83_vm0, %v360_v6  ;;  %344 = vmatmul.mubr.msk.bf16.vlgmr.msra.gmra.mrb[0].mxu1 %vm83_vm0, %v361_v7 }
  0xe1   :  { %v341_v9 = vpop.f32.mrb[0].mxu0  ;;  %v345_v10 = vpop.f32.mrb[0].mxu1 }
  0xe2   :  { %v201_v11 = vadd.f32 %v341_v9, %v286_v8  ;;  %v205_v12 = vadd.f32 %v345_v10, %v286_v8  ;;  %v134_v13 = vpop.f32.mrb[1].mxu0  ;;  %v150_v14 = vpop.f32.mrb[1].mxu1 }
  0xe3   :  { %v199_v15 = vadd.f32 %v286_v8, %v134_v13  ;;  %v203_v16 = vadd.f32 %v286_v8, %v150_v14  ;;  %v342_v17 = vpop.f32.mrb[2].mxu0  ;;  %v346_v18 = vpop.f32.mrb[2].mxu1 }
  0xe4   :  { %vm209_vm2 = vcmp.ge.f32.partialorder %v201_v11, 0.0  ;;  %v217_v19 = vmul.f32 0.1, %v201_v11  ;;  %vm213_vm3 = vcmp.ge.f32.partialorder %v205_v12, 0.0  ;;  %v221_v20 = vmul.f32 0.1, %v205_v12 }
  0xe5   :  { %vm207_vm4 = vcmp.ge.f32.partialorder %v199_v15, 0.0  ;;  %v215_v21 = vmul.f32 0.1, %v199_v15  ;;  %vm211_vm5 = vcmp.ge.f32.partialorder %v203_v16, 0.0  ;;  %v219_v22 = vmul.f32 0.1, %v203_v16 }
  0xe6   :  { %v202_v23 = vadd.f32 %v342_v17, %v286_v8  ;;  %v206_v24 = vadd.f32 %v346_v18, %v286_v8  ;;  %v137_v25 = vpop.f32.mrb[3].mxu0  ;;  %v153_v26 = vpop.f32.mrb[3].mxu1  ;;  %v225_v27 = vsel %vm209_vm2, %v201_v11, %v217_v19  ;;  %v229_v28 = vsel %vm213_vm3, %v205_v12, %v221_v20 }
  0xe7   :  { %v200_v29 = vadd.f32 %v286_v8, %v137_v25  ;;  %v204_v30 = vadd.f32 %v286_v8, %v153_v26  ;;  %v223_v35 = vsel %vm207_vm4, %v199_v15, %v215_v21  ;;  %v227_v36 = vsel %vm211_vm5, %v203_v16, %v219_v22 }
  0xe8   :  { %vm210_vm6 = vcmp.ge.f32.partialorder %v202_v23, 0.0  ;;  %v218_v31 = vmul.f32 0.1, %v202_v23  ;;  %vm214_vm7 = vcmp.ge.f32.partialorder %v206_v24, 0.0  ;;  %v222_v32 = vmul.f32 0.1, %v206_v24 }
  0xe9   :  { %vm208_vm8 = vcmp.ge.f32.partialorder %v200_v29, 0.0  ;;  %v216_v33 = vmul.f32 0.1, %v200_v29  ;;  %vm212_vm9 = vcmp.ge.f32.partialorder %v204_v30, 0.0  ;;  %v220_v34 = vmul.f32 0.1, %v204_v30 }
  0xea   :  { %v226_v37 = vsel %vm210_vm6, %v202_v23, %v218_v31  ;;  %v230_v38 = vsel %vm214_vm7, %v206_v24, %v222_v32 }
  0xeb   :  { %v311_v39 = vpack.c.bf16 %v226_v37, %v225_v27  ;;  %v321_v40 = vpack.c.bf16 %v230_v38, %v229_v28  ;;  %v224_v41 = vsel %vm208_vm8, %v200_v29, %v216_v33  ;;  %v228_v42 = vsel %vm212_vm9, %v204_v30, %v220_v34 }
  0xec   :  { %v306_v43 = vpack.c.bf16 %v224_v41, %v223_v35  ;;  %v316_v44 = vpack.c.bf16 %v228_v42, %v227_v36 }
  0xed   :  { %323 = vst [vmem:[%s427_s3 + $0x8] sm:$0xff] %v311_v39   ;;  %325 = vst [vmem:[%s427_s3 + $0x18] sm:$0xff] %v321_v40  }
  0xee   :  { %307 = vst [vmem:[%s427_s3] sm:$0xff] %v306_v43   ;;  %324 = vst [vmem:[%s427_s3 + $0x10] sm:$0xff] %v316_v44  }

// kernel: forward.17
= control target key start
LH: loop header
LB: loop body
LE: loop exit
PB: predicated region body
PF: predicated region fallthrough
CT: control target
= control target key end

     0   :  { %vm89_vm0 = vcmask 392192   ;;  %s339_s1 = inlined_call_operand.vmem [shape: bf16[48,1], index: 1, kind: input, shape index: {}]   ;;  %s340_s2 = inlined_call_operand.<no memory space> [shape: f32[1,1], index: 2, kind: input, shape index: {}]   ;;  %s341_s0 = inlined_call_operand.vmem [shape: bf16[60,48], index: 0, kind: input, shape index: {}]   ;;  %s342_s3 = inlined_call_operand.vmem [shape: f32[60,1], index: 3, kind: output, shape index: {}]  }
   0x1   :  { %v260_v0 = vld [vmem:[%s339_s1] sm:$0xff]   ;;  %v8_v1 = vstv %s340_s2  ;;  %v261_v2 = vld [vmem:[%s339_s1 + $0x8] sm:$0xff]   ;;  %v262_v3 = vld [vmem:[%s339_s1 + $0x10] sm:$0xff]  }
   0x2   :  { %9 = vst [vmem:[#allocation3] sm:$0x1] %v8_v1  ;;  %240 = vmatprep.subr.bf16.mxu0 %v260_v0  ;;  %254 = vmatprep.subr.bf16.mxu1 %v260_v0  ;;  %v263_v4 = vld [vmem:[%s341_s0] sm:$0xff]   ;;  %v264_v5 = vld [vmem:[%s341_s0 + $0x10] sm:$0xff]   ;;  %v265_v6 = vld [vmem:[%s341_s0 + $0x8] sm:$0xff]  }
   0x3   :  { %241 = vmatpush3.bf16.msra.mxu0 %v260_v0  ;;  %257 = vmatpush3.bf16.msra.mxu1 %v260_v0  ;;  %v266_v7 = vld [vmem:[%s341_s0 + $0x18] sm:$0xff]  }
   0x4   :  { %242 = vmatprep.subr.bf16.mxu0 %v261_v2  ;;  %255 = vmatprep.subr.bf16.mxu1 %v261_v2 }
   0x5   :  { %246 = vmatprep.mubr.msk.bf16.mxu0 %vm89_vm0, %v263_v4  ;;  %250 = vmatprep.mubr.msk.bf16.mxu1 %vm89_vm0, %v264_v5 }
   0x7   :  { %243 = vmatpush3.bf16.msra.mxu0 %v261_v2  ;;  %258 = vmatpush3.bf16.msra.mxu1 %v261_v2 }
   0x8   :  { %244 = vmatprep.subr.bf16.mxu0 %v262_v3  ;;  %256 = vmatprep.subr.bf16.mxu1 %v262_v3 }
   0x9   :  { %v232_v8 = vld [vmem:[#allocation3] ss:$0 sm:$0xff] }
   0xb   :  { %245 = vmatpush3.bf16.msra.mxu0 %v262_v3  ;;  %259 = vmatpush3.bf16.msra.mxu1 %v262_v3 }
   0xe   :  { %247 = vmatmul.mubr.msk.bf16.vlgmr.msra.gmra.mrb[0].mxu0 %vm89_vm0, %v265_v6  ;;  %251 = vmatmul.mubr.msk.bf16.vlgmr.msra.gmra.mrb[0].mxu1 %vm89_vm0, %v266_v7 }
  0xe1   :  { %v248_v9 = vpop.f32.mrb[0].mxu0  ;;  %v252_v10 = vpop.f32.mrb[0].mxu1 }
  0xe2   :  { %v203_v11 = vadd.f32 %v248_v9, %v232_v8  ;;  %v207_v12 = vadd.f32 %v252_v10, %v232_v8  ;;  %v136_v13 = vpop.f32.mrb[1].mxu0  ;;  %v152_v14 = vpop.f32.mrb[1].mxu1 }
  0xe3   :  { %v201_v15 = vadd.f32 %v232_v8, %v136_v13  ;;  %v205_v16 = vadd.f32 %v232_v8, %v152_v14  ;;  %v249_v17 = vpop.f32.mrb[2].mxu0  ;;  %v253_v18 = vpop.f32.mrb[2].mxu1 }
  0xe4   :  { %211 = vst [vmem:[%s342_s3 + $0x10] sm:$0xff] %v203_v11  ;;  %215 = vst [vmem:[%s342_s3 + $0x30] sm:$0xff] %v207_v12  ;;  %v204_v19 = vadd.f32 %v249_v17, %v232_v8  ;;  %v208_v20 = vadd.f32 %v253_v18, %v232_v8  ;;  %v139_v21 = vpop.f32.mrb[3].mxu0  ;;  %v155_v22 = vpop.f32.mrb[3].mxu1 }
  0xe5   :  { %209 = vst [vmem:[%s342_s3] sm:$0xff] %v201_v15  ;;  %213 = vst [vmem:[%s342_s3 + $0x20] sm:$0xff] %v205_v16  ;;  %v202_v23 = vadd.f32 %v232_v8, %v139_v21  ;;  %v206_v24 = vadd.f32 %v232_v8, %v155_v22 }
  0xe6   :  { %212 = vst [vmem:[%s342_s3 + $0x18] sm:$0xff] %v204_v19  ;;  %216 = vst [vmem:[%s342_s3 + $0x38] sm:$0xff] %v208_v20 }
  0xe7   :  { %210 = vst [vmem:[%s342_s3 + $0x8] sm:$0xff] %v202_v23  ;;  %214 = vst [vmem:[%s342_s3 + $0x28] sm:$0xff] %v206_v24 }

// kernel: forward.13
= control target key start
LH: loop header
LB: loop body
LE: loop exit
PB: predicated region body
PF: predicated region fallthrough
CT: control target
= control target key end

     0   :  { %vm83_vm0 = vcmask 326656   ;;  %vm96_vm1 = vcmask 1043456   ;;  %s491_s0 = inlined_call_operand.vmem [shape: bf16[56,40], index: 0, kind: input, shape index: {}]   ;;  %s492_s1 = inlined_call_operand.vmem [shape: bf16[40,16], index: 1, kind: input, shape index: {}]   ;;  %s493_s2 = inlined_call_operand.vmem [shape: f32[1,16], index: 2, kind: input, shape index: {}]   ;;  %s494_s3 = inlined_call_operand.vmem [shape: bf16[56,16], index: 3, kind: output, shape index: {}]  }
   0x1   :  { %v422_v0 = vld [vmem:[%s492_s1] sm:$0xff]   ;;  %v423_v1 = vld [vmem:[%s492_s1 + $0x8] sm:$0xff]   ;;  %v424_v2 = vld [vmem:[%s492_s1 + $0x10] ss:$0 sps:$4 sm:$0xff]  }
   0x2   :  { %400 = vmatprep.subr.bf16.mxu0 %v422_v0  ;;  %414 = vmatprep.subr.bf16.mxu1 %v422_v0  ;;  %v425_v3 = vld [vmem:[%s491_s0] sm:$0xff]   ;;  %v426_v4 = vld [vmem:[%s491_s0 + $0x10] sm:$0xff]   ;;  %v98_v5 = vsel %vm96_vm1, %v424_v2, 0  ;;  %v427_v6 = vld [vmem:[%s491_s0 + $0x8] sm:$0xff]  }
   0x3   :  { %401 = vmatpush3.bf16.msra.mxu0 %v422_v0  ;;  %417 = vmatpush3.bf16.msra.mxu1 %v422_v0  ;;  %v428_v7 = vld [vmem:[%s491_s0 + $0x18] sm:$0xff]   ;;  %v353_v8 = vld [vmem:[%s493_s2] ss:$0 sm:$0xff] }
   0x4   :  { %402 = vmatprep.subr.bf16.mxu0 %v423_v1  ;;  %415 = vmatprep.subr.bf16.mxu1 %v423_v1 }
   0x5   :  { %406 = vmatprep.mubr.msk.bf16.mxu0 %vm83_vm0, %v425_v3  ;;  %410 = vmatprep.mubr.msk.bf16.mxu1 %vm83_vm0, %v426_v4 }
   0x7   :  { %403 = vmatpush3.bf16.msra.mxu0 %v423_v1  ;;  %418 = vmatpush3.bf16.msra.mxu1 %v423_v1 }
   0x8   :  { %420 = vmatprep.subr.msk.bf16.mxu0 %vm96_vm1, %v424_v2  ;;  %421 = vmatprep.subr.msk.bf16.mxu1 %vm96_vm1, %v424_v2 }
   0xb   :  { %405 = vmatpush3.bf16.msra.mxu0 %v98_v5  ;;  %419 = vmatpush3.bf16.msra.mxu1 %v98_v5 }
   0xe   :  { %407 = vmatmul.mubr.msk.bf16.vlgmr.msra.gmra.mrb[0].mxu0 %vm83_vm0, %v427_v6  ;;  %411 = vmatmul.mubr.msk.bf16.vlgmr.msra.gmra.mrb[0].mxu1 %vm83_vm0, %v428_v7 }
  0xe1   :  { %v408_v9 = vpop.f32.mrb[0].mxu0  ;;  %v412_v10 = vpop.f32.mrb[0].mxu1 }
  0xe2   :  { %v201_v11 = vadd.f32 %v408_v9, %v353_v8  ;;  %v205_v12 = vadd.f32 %v412_v10, %v353_v8  ;;  %v134_v13 = vpop.f32.mrb[1].mxu0  ;;  %v150_v14 = vpop.f32.mrb[1].mxu1 }
  0xe3   :  { %v199_v15 = vadd.f32 %v353_v8, %v134_v13  ;;  %v203_v16 = vadd.f32 %v353_v8, %v150_v14  ;;  %v409_v17 = vpop.f32.mrb[2].mxu0  ;;  %v413_v18 = vpop.f32.mrb[2].mxu1 }
  0xe4   :  { %vm209_vm2 = vcmp.ge.f32.partialorder %v201_v11, 0.0  ;;  %v217_v19 = vmul.f32 0.1, %v201_v11  ;;  %vm213_vm3 = vcmp.ge.f32.partialorder %v205_v12, 0.0  ;;  %v221_v20 = vmul.f32 0.1, %v205_v12 }
  0xe5   :  { %vm207_vm4 = vcmp.ge.f32.partialorder %v199_v15, 0.0  ;;  %v215_v21 = vmul.f32 0.1, %v199_v15  ;;  %vm211_vm5 = vcmp.ge.f32.partialorder %v203_v16, 0.0  ;;  %v219_v22 = vmul.f32 0.1, %v203_v16 }
  0xe6   :  { %v202_v23 = vadd.f32 %v409_v17, %v353_v8  ;;  %v206_v24 = vadd.f32 %v413_v18, %v353_v8  ;;  %v137_v25 = vpop.f32.mrb[3].mxu0  ;;  %v153_v26 = vpop.f32.mrb[3].mxu1  ;;  %v225_v27 = vsel %vm209_vm2, %v201_v11, %v217_v19  ;;  %v229_v28 = vsel %vm213_vm3, %v205_v12, %v221_v20 }
  0xe7   :  { %v200_v29 = vadd.f32 %v353_v8, %v137_v25  ;;  %v204_v30 = vadd.f32 %v353_v8, %v153_v26  ;;  %v223_v35 = vsel %vm207_vm4, %v199_v15, %v215_v21  ;;  %v227_v36 = vsel %vm211_vm5, %v203_v16, %v219_v22 }
  0xe8   :  { %vm210_vm6 = vcmp.ge.f32.partialorder %v202_v23, 0.0  ;;  %v218_v31 = vmul.f32 0.1, %v202_v23  ;;  %vm214_vm7 = vcmp.ge.f32.partialorder %v206_v24, 0.0  ;;  %v222_v32 = vmul.f32 0.1, %v206_v24 }
  0xe9   :  { %vm208_vm8 = vcmp.ge.f32.partialorder %v200_v29, 0.0  ;;  %v216_v33 = vmul.f32 0.1, %v200_v29  ;;  %vm212_vm9 = vcmp.ge.f32.partialorder %v204_v30, 0.0  ;;  %v220_v34 = vmul.f32 0.1, %v204_v30 }
  0xea   :  { %v226_v37 = vsel %vm210_vm6, %v202_v23, %v218_v31  ;;  %v230_v38 = vsel %vm214_vm7, %v206_v24, %v222_v32 }
  0xeb   :  { %v378_v39 = vpack.c.bf16 %v226_v37, %v225_v27  ;;  %v388_v40 = vpack.c.bf16 %v230_v38, %v229_v28  ;;  %v224_v41 = vsel %vm208_vm8, %v200_v29, %v216_v33  ;;  %v228_v42 = vsel %vm212_vm9, %v204_v30, %v220_v34 }
  0xec   :  { %v373_v43 = vpack.c.bf16 %v224_v41, %v223_v35  ;;  %v383_v44 = vpack.c.bf16 %v228_v42, %v227_v36 }
  0xed   :  { %390 = vst [vmem:[#allocation3 + $0x8] sm:$0xff] %v378_v39   ;;  %392 = vst [vmem:[#allocation3 + $0x18] sm:$0xff] %v388_v40  }
  0xee   :  { %374 = vst [vmem:[#allocation3] sm:$0xff] %v373_v43   ;;  %391 = vst [vmem:[#allocation3 + $0x10] sm:$0xff] %v383_v44  }
  0xf4   :  { %v292_v45 = vld [vmem:[#allocation3 + $0x8] sm:$0xff]   ;;  %v300_v46 = vld [vmem:[#allocation3 + $0x18] sm:$0xf] }
  0xf5   :  { %293 = vst [vmem:[%s494_s3 + $0x8] sm:$0xff] %v292_v45   ;;  %301 = vst [vmem:[%s494_s3 + $0x18] sm:$0xf] %v300_v46  ;;  %v288_v47 = vld [vmem:[#allocation3] sm:$0xff]   ;;  %v296_v48 = vld [vmem:[#allocation3 + $0x10] sm:$0xff]  }
  0xf6   :  { %289 = vst [vmem:[%s494_s3] sm:$0xff] %v288_v47   ;;  %297 = vst [vmem:[%s494_s3 + $0x10] sm:$0xff] %v296_v48  }

// kernel: forward.14
= control target key start
LH: loop header
LB: loop body
LE: loop exit
PB: predicated region body
PF: predicated region fallthrough
CT: control target
= control target key end

     0   :  { %vm89_vm0 = vcmask 392192   ;;  %s396_s0 = inlined_call_operand.vmem [shape: bf16[56,48], index: 0, kind: input, shape index: {}]   ;;  %s397_s1 = inlined_call_operand.vmem [shape: bf16[48,1], index: 1, kind: input, shape index: {}]   ;;  %s398_s2 = inlined_call_operand.<no memory space> [shape: f32[1,1], index: 2, kind: input, shape index: {}]   ;;  %s399_s3 = inlined_call_operand.vmem [shape: f32[56,1], index: 3, kind: output, shape index: {}]  }
   0x1   :  { %v8_v0 = vstv %s398_s2  ;;  %v320_v1 = vld [vmem:[%s397_s1] sm:$0xff]   ;;  %v321_v2 = vld [vmem:[%s397_s1 + $0x8] sm:$0xff]   ;;  %v322_v3 = vld [vmem:[%s397_s1 + $0x10] sm:$0xff]  }
   0x2   :  { %9 = vst [vmem:[#allocation3] sm:$0x1] %v8_v0  ;;  %300 = vmatprep.subr.bf16.mxu0 %v320_v1  ;;  %314 = vmatprep.subr.bf16.mxu1 %v320_v1  ;;  %v323_v4 = vld [vmem:[%s396_s0] sm:$0xff]   ;;  %v324_v5 = vld [vmem:[%s396_s0 + $0x10] sm:$0xff]   ;;  %v325_v6 = vld [vmem:[%s396_s0 + $0x8] sm:$0xff]  }
   0x3   :  { %301 = vmatpush3.bf16.msra.mxu0 %v320_v1  ;;  %317 = vmatpush3.bf16.msra.mxu1 %v320_v1  ;;  %v326_v7 = vld [vmem:[%s396_s0 + $0x18] sm:$0xff]  }
   0x4   :  { %302 = vmatprep.subr.bf16.mxu0 %v321_v2  ;;  %315 = vmatprep.subr.bf16.mxu1 %v321_v2 }
   0x5   :  { %306 = vmatprep.mubr.msk.bf16.mxu0 %vm89_vm0, %v323_v4  ;;  %310 = vmatprep.mubr.msk.bf16.mxu1 %vm89_vm0, %v324_v5 }
   0x7   :  { %303 = vmatpush3.bf16.msra.mxu0 %v321_v2  ;;  %318 = vmatpush3.bf16.msra.mxu1 %v321_v2 }
   0x8   :  { %304 = vmatprep.subr.bf16.mxu0 %v322_v3  ;;  %316 = vmatprep.subr.bf16.mxu1 %v322_v3 }
   0x9   :  { %v292_v8 = vld [vmem:[#allocation3] ss:$0 sm:$0xff] }
   0xb   :  { %305 = vmatpush3.bf16.msra.mxu0 %v322_v3  ;;  %319 = vmatpush3.bf16.msra.mxu1 %v322_v3 }
   0xe   :  { %307 = vmatmul.mubr.msk.bf16.vlgmr.msra.gmra.mrb[0].mxu0 %vm89_vm0, %v325_v6  ;;  %311 = vmatmul.mubr.msk.bf16.vlgmr.msra.gmra.mrb[0].mxu1 %vm89_vm0, %v326_v7 }
  0xe1   :  { %v308_v9 = vpop.f32.mrb[0].mxu0  ;;  %v312_v10 = vpop.f32.mrb[0].mxu1 }
  0xe2   :  { %v203_v11 = vadd.f32 %v308_v9, %v292_v8  ;;  %v207_v12 = vadd.f32 %v312_v10, %v292_v8  ;;  %v136_v13 = vpop.f32.mrb[1].mxu0  ;;  %v152_v14 = vpop.f32.mrb[1].mxu1 }
  0xe3   :  { %v201_v15 = vadd.f32 %v292_v8, %v136_v13  ;;  %v205_v16 = vadd.f32 %v292_v8, %v152_v14  ;;  %v309_v17 = vpop.f32.mrb[2].mxu0  ;;  %v313_v18 = vpop.f32.mrb[2].mxu1 }
  0xe4   :  { %263 = vst [vmem:[%s399_s3 + $0x10] sm:$0xff] %v203_v11  ;;  %271 = vst [vmem:[%s399_s3 + $0x30] sm:$0xff] %v207_v12  ;;  %v204_v19 = vadd.f32 %v309_v17, %v292_v8  ;;  %v139_v20 = vpop.f32.mrb[3].mxu0  ;;  %v155_v21 = vpop.f32.mrb[3].mxu1 }
  0xe5   :  { %259 = vst [vmem:[%s399_s3] sm:$0xff] %v201_v15  ;;  %267 = vst [vmem:[%s399_s3 + $0x20] sm:$0xff] %v205_v16  ;;  %v202_v22 = vadd.f32 %v292_v8, %v139_v20  ;;  %v206_v23 = vadd.f32 %v292_v8, %v155_v21 }
  0xe6   :  { %265 = vst [vmem:[%s399_s3 + $0x18] sm:$0xff] %v204_v19 }
  0xe7   :  { %261 = vst [vmem:[%s399_s3 + $0x8] sm:$0xff] %v202_v22  ;;  %269 = vst [vmem:[%s399_s3 + $0x28] sm:$0xff] %v206_v23 }

</bundles_post_ra>
